<compile_context>
chip_gen: v7x
topology: tpu7x:2x2x1
jax: 0.10.0
libtpu: 0.0.40
codegen_flags: <defaults>
</compile_context>

<pallas_src>
import jax
import jax.numpy as jnp
from jax.experimental import pallas as pl
from jax.experimental.pallas import tpu as pltpu
import numpy as np


# ----------------------------- Pallas kernel ------------------------------- #
def bilstm_kernel(x2_ref, mask_ref, h0_ref, c0_ref, wih_ref, b_ref, whh_ref,
                  out_ref, hn_ref, gin_ref):
    T, B, H2 = out_ref.shape                 # (T, Bp, 2H); Bp == 8 (full sublane tile)

    # ---- hoisted input projection (preamble, off the serial chain) ------------
    # ONE lane-dense (T*Bp, 2E) x (2E, 8H) MXU op; biases folded in.
    # Gate columns: [i | f | o | g], each 2H block = [fwd @ t=i | bwd @ t=T-1-i].
    gin_ref[...] = (
        jnp.dot(x2_ref[...], wih_ref[...], preferred_element_type=jnp.float32)
        + b_ref[...])                        # (T*Bp, 8H) f32

    whh = whh_ref[...]                       # (2H, 8H) bf16, block structure baked in wrapper
    h = h0_ref[...]                          # (Bp, 2H) f32 combined state [h_fwd | h_bwd]
    c = c0_ref[...]

    # Fully unrolled recurrence. One recurrent matmul + one activation pass drives BOTH
    # directions per step (fwd at time i, bwd at time T-1-i).
    for i in range(T):
        g = jnp.dot(h.astype(whh.dtype), whh,
                    preferred_element_type=jnp.float32)        # (Bp, 8H)
        g = g + gin_ref[pl.ds(i * B, B), :]                    # static, sublane-aligned

        sg = jax.nn.sigmoid(g[:, :3 * H2])                     # i|f|o slab -> one EUP pass
        gg = jnp.tanh(g[:, 3 * H2:])                           # g gate
        c_new = sg[:, H2:2 * H2] * c + sg[:, :H2] * gg         # f*c + i*g
        h_new = sg[:, 2 * H2:] * jnp.tanh(c_new)               # o*tanh(c)

        m = mask_ref[i]                                        # (Bp, 2H) 0/1 floats
        h = h + m * (h_new - h)                                # freeze outside valid range
        c = c + m * (c_new - c)
        out_ref[i] = m * h                                     # zero padded steps; 1 store/step

    # forward h_n frozen at t=len-1; backward h_n = state after t=0
    hn_ref[...] = h


# ------------------------------ wrapper ------------------------------------ #
def bilstm_encoder_forward(captions, caption_lengths, hidden, params):
    """Reproduces bilstmEncoder.forward (eval mode) -> (wordEncoding, sentenceEncoding)."""
    emb_table = params["embedding"]                  # (numTokens, E)
    B, T = captions.shape
    E = emb_table.shape[1]
    H = params["whh_f"].shape[0]                     # per-direction hidden size
    H2 = 2 * H
    Bp = ((B + 7) // 8) * 8                          # pad batch to a full sublane tile

    # TODO(synk): torch.nn.Dropout is identity in eval mode; dropout not applied here.

    # time-major embeddings; fwd stream and time-reversed bwd stream packed side by side
    x = emb_table[captions.T]                                    # (T, B, E)
    x = jnp.pad(x, ((0, 0), (0, Bp - B), (0, 0)))                # (T, Bp, E)
    x_comb = jnp.concatenate([x, x[::-1]], axis=-1)              # (T, Bp, 2E)
    x2 = x_comb.reshape(T * Bp, 2 * E).astype(jnp.bfloat16)

    # combined per-step validity mask: lanes [:H] fwd (t=i), lanes [H:] bwd (t=T-1-i)
    lens = jnp.pad(caption_lengths.astype(jnp.int32), (0, Bp - B))
    t_idx = jnp.arange(T, dtype=jnp.int32)
    m_f = (t_idx[:, None] < lens[None, :]).astype(jnp.float32)           # (T, Bp)
    m_b = ((T - 1 - t_idx)[:, None] < lens[None, :]).astype(jnp.float32)
    mask = jnp.concatenate(
        [jnp.broadcast_to(m_f[:, :, None], (T, Bp, H)),
         jnp.broadcast_to(m_b[:, :, None], (T, Bp, H))], axis=-1)        # (T, Bp, 2H)

    # fused weights; per-direction weights are stored in torch gate order i,f,g,o.
    def gcol(w, g):
        return w[:, g * H:(g + 1) * H]

    zE = jnp.zeros((E, H), jnp.float32)
    zH = jnp.zeros((H, H), jnp.float32)
    wih_cols, whh_cols, b_cols = [], [], []
    for g in (0, 1, 3, 2):                   # combined order i, f, o, g (sigmoid gates contiguous)
        wih_cols += [jnp.concatenate([gcol(params["wih_f"], g), zE], axis=0),
                     jnp.concatenate([zE, gcol(params["wih_r"], g)], axis=0)]
        whh_cols += [jnp.concatenate([gcol(params["whh_f"], g), zH], axis=0),
                     jnp.concatenate([zH, gcol(params["whh_r"], g)], axis=0)]
        b_cols += [gcol(params["b_f"], g), gcol(params["b_r"], g)]
    wih_c = jnp.concatenate(wih_cols, axis=1).astype(jnp.bfloat16)       # (2E, 8H)
    whh_c = jnp.concatenate(whh_cols, axis=1).astype(jnp.bfloat16)       # (2H, 8H)
    b_c = jnp.concatenate(b_cols, axis=1).astype(jnp.float32)            # (1, 8H)

    h0, c0 = hidden                                                      # each (2, B, H)
    h0c = jnp.pad(jnp.concatenate([h0[0], h0[1]], axis=-1),
                  ((0, Bp - B), (0, 0))).astype(jnp.float32)             # (Bp, 2H)
    c0c = jnp.pad(jnp.concatenate([c0[0], c0[1]], axis=-1),
                  ((0, Bp - B), (0, 0))).astype(jnp.float32)

    vmem = pl.BlockSpec(memory_space=pltpu.MemorySpace.VMEM)
    trace, hn = pl.pallas_call(
        bilstm_kernel,
        out_shape=(jax.ShapeDtypeStruct((T, Bp, H2), jnp.float32),   # step-ordered trace
                   jax.ShapeDtypeStruct((Bp, H2), jnp.float32)),     # combined h_n
        in_specs=[vmem] * 7,
        out_specs=(vmem, vmem),
        scratch_shapes=[pltpu.VMEM((T * Bp, 4 * H2), jnp.float32)],  # hoisted gate inputs
    )(x2, mask, h0c, c0c, wih_c, b_c, whh_c)

    # de-interleave off the serial path: fwd half already time-ordered; bwd half was
    # computed at step i = T-1-t, so reverse it.  XLA fuses rev+concat into the transpose.
    fwd = trace[:, :B, :H]
    bwd = trace[::-1, :B, H:]
    word_encoding = jnp.transpose(jnp.concatenate([fwd, bwd], axis=-1), (1, 2, 0))  # (B,2H,T)
    sentence_encoding = hn[:B]                                                      # (B, 2H)
    return word_encoding, sentence_encoding


# ------------------------ pure-JAX reference (check) ----------------------- #
def reference_forward(captions, caption_lengths, hidden, params):
    emb = params["embedding"][captions].astype(jnp.float32)     # (B, T, E)
    x = jnp.transpose(emb, (1, 0, 2))                            # (T, B, E)
    T, B, E = x.shape
    H = params["whh_f"].shape[0]
    lens = caption_lengths.astype(jnp.int32).reshape(B, 1)
    h0, c0 = hidden

    def cell(x_t, h, c, wih, whh, b):
        g = x_t @ wih + h @ whh + b
        i = jax.nn.sigmoid(g[:, 0 * H:1 * H]); f = jax.nn.sigmoid(g[:, 1 * H:2 * H])
        gg = jnp.tanh(g[:, 2 * H:3 * H]);      o = jax.nn.sigmoid(g[:, 3 * H:4 * H])
        c_new = f * c + i * gg
        return o * jnp.tanh(c_new), c_new

    def run(direction, h, c, wih, whh, b):
        outs = [None] * T
        ts = range(T) if direction == "fwd" else range(T - 1, -1, -1)
        for t in ts:
            h_new, c_new = cell(x[t], h, c, wih, whh, b)
            valid = t < lens
            h = jnp.where(valid, h_new, h)
            c = jnp.where(valid, c_new, c)
            outs[t] = jnp.where(valid, h, 0.0)
        return jnp.stack(outs, 0), h

    of, hf = run("fwd", h0[0], c0[0], params["wih_f"], params["whh_f"], params["b_f"])
    orr, hr = run("bwd", h0[1], c0[1], params["wih_r"], params["whh_r"], params["b_r"])
    output = jnp.concatenate([of, orr], -1)
    return jnp.transpose(output, (1, 2, 0)), jnp.concatenate([hf, hr], -1)


# --------------------------------- main ------------------------------------ #
if __name__ == "__main__":
    numTokens, embeddingSize, numHiddenFeatures = 50, 32, 32
    H = numHiddenFeatures // 2                   # per-direction hidden size (=16, so 8H = 128 lanes)
    B, T = 4, 18                                 # total_length = 18

    key = jax.random.PRNGKey(0)
    keys = jax.random.split(key, 12)
    bound = 1.0 / np.sqrt(H)

    params = {
        "embedding": jax.random.uniform(keys[0], (numTokens, embeddingSize),
                                        jnp.float32, -0.1, 0.1),
        # stored pre-transposed: (E, 4H) and (H, 4H) in torch gate order i,f,g,o;
        # fused biases (1, 4H)
        "wih_f": jax.random.uniform(keys[1], (embeddingSize, 4 * H), jnp.float32, -bound, bound),
        "whh_f": jax.random.uniform(keys[2], (H, 4 * H), jnp.float32, -bound, bound),
        "b_f":  (jax.random.uniform(keys[3], (1, 4 * H), jnp.float32, -bound, bound)
                 + jax.random.uniform(keys[4], (1, 4 * H), jnp.float32, -bound, bound)),
        "wih_r": jax.random.uniform(keys[5], (embeddingSize, 4 * H), jnp.float32, -bound, bound),
        "whh_r": jax.random.uniform(keys[6], (H, 4 * H), jnp.float32, -bound, bound),
        "b_r":  (jax.random.uniform(keys[7], (1, 4 * H), jnp.float32, -bound, bound)
                 + jax.random.uniform(keys[8], (1, 4 * H), jnp.float32, -bound, bound)),
    }

    captions = jax.random.randint(keys[9], (B, T), 0, numTokens, dtype=jnp.int32)
    caption_lengths = jnp.array([18, 12, 7, 3], dtype=jnp.int32)   # enforce_sorted=False OK
    hidden = (jnp.zeros((2, B, H), jnp.float32), jnp.zeros((2, B, H), jnp.float32))

    word_enc, sent_enc = bilstm_encoder_forward(captions, caption_lengths, hidden, params)
    jax.block_until_ready((word_enc, sent_enc))

    # sanity-check against a pure-JAX f32 reference (kernel uses bf16 matmul operands,
    # f32 accumulation/carries -> loosened tolerance)
    ref_word, ref_sent = reference_forward(captions, caption_lengths, hidden, params)
    assert word_enc.shape == (B, 2 * H, T) and sent_enc.shape == (B, 2 * H)
    np.testing.assert_allclose(np.asarray(word_enc), np.asarray(ref_word), atol=2e-2, rtol=2e-2)
    np.testing.assert_allclose(np.asarray(sent_enc), np.asarray(ref_sent), atol=2e-2, rtol=2e-2)

    print("KERNEL_OK")
</pallas_src>

<mosaic_0001>
module attributes {stable_mosaic.version = 11 : i64} {
  func.func @bilstm_kernel(%arg0: memref<144x64xbf16, #tpu.memory_space<vmem>>, %arg1: memref<18x8x32xf32, #tpu.memory_space<vmem>>, %arg2: memref<8x32xf32, #tpu.memory_space<vmem>>, %arg3: memref<8x32xf32, #tpu.memory_space<vmem>>, %arg4: memref<64x128xbf16, #tpu.memory_space<vmem>>, %arg5: memref<1x128xf32, #tpu.memory_space<vmem>>, %arg6: memref<32x128xbf16, #tpu.memory_space<vmem>>, %arg7: memref<18x8x32xf32, #tpu.memory_space<vmem>>, %arg8: memref<8x32xf32, #tpu.memory_space<vmem>>, %arg9: memref<144x128xf32, #tpu.memory_space<vmem>>) attributes {dimension_semantics = [], scalar_prefetch = 0 : i64, scratch_operands = 1 : i64, tpu.core_type = #tpu.core_type<tc>} {
    %c0 = arith.constant 0 : index
    %c0_0 = arith.constant 0 : index
    %0 = vector.load %arg0[%c0, %c0_0] : memref<144x64xbf16, #tpu.memory_space<vmem>>, vector<144x64xbf16>
    %c0_1 = arith.constant 0 : index
    %c0_2 = arith.constant 0 : index
    %1 = vector.load %arg4[%c0_1, %c0_2] : memref<64x128xbf16, #tpu.memory_space<vmem>>, vector<64x128xbf16>
    %cst = arith.constant dense<0.000000e+00> : vector<144x128xf32>
    %2 = tpu.matmul %0, %1, %cst {dimension_numbers = #tpu.dot_dimension_numbers<[1], [0], [0], [1], [0, 0, 1, 1], [], []>} : vector<144x64xbf16>, vector<64x128xbf16>, vector<144x128xf32> -> vector<144x128xf32>
    %c0_3 = arith.constant 0 : index
    %c0_4 = arith.constant 0 : index
    %3 = vector.load %arg5[%c0_3, %c0_4] : memref<1x128xf32, #tpu.memory_space<vmem>>, vector<1x128xf32>
    %4 = vector.broadcast %3 : vector<1x128xf32> to vector<144x128xf32>
    %5 = arith.addf %2, %4 : vector<144x128xf32>
    %c0_5 = arith.constant 0 : index
    %c0_6 = arith.constant 0 : index
    %6 = vector.load %arg9[%c0_5, %c0_6] : memref<144x128xf32, #tpu.memory_space<vmem>>, vector<144x128xf32>
    tpu.vector_store %arg9[%c0_5, %c0_6], %5 {strides = array<i32>} : memref<144x128xf32, #tpu.memory_space<vmem>>, vector<144x128xf32>,
    %c0_7 = arith.constant 0 : index
    %c0_8 = arith.constant 0 : index
    %7 = vector.load %arg6[%c0_7, %c0_8] : memref<32x128xbf16, #tpu.memory_space<vmem>>, vector<32x128xbf16>
    %c0_9 = arith.constant 0 : index
    %c0_10 = arith.constant 0 : index
    %8 = vector.load %arg2[%c0_9, %c0_10] : memref<8x32xf32, #tpu.memory_space<vmem>>, vector<8x32xf32>
    %c0_11 = arith.constant 0 : index
    %c0_12 = arith.constant 0 : index
    %9 = vector.load %arg3[%c0_11, %c0_12] : memref<8x32xf32, #tpu.memory_space<vmem>>, vector<8x32xf32>
    %10 = arith.truncf %8 : vector<8x32xf32> to vector<8x32xbf16>
    %cst_13 = arith.constant dense<0.000000e+00> : vector<8x128xf32>
    %11 = tpu.matmul %10, %7, %cst_13 {dimension_numbers = #tpu.dot_dimension_numbers<[1], [0], [0], [1], [0, 0, 1, 1], [], []>} : vector<8x32xbf16>, vector<32x128xbf16>, vector<8x128xf32> -> vector<8x128xf32>
    %c0_14 = arith.constant 0 : index
    %c0_15 = arith.constant 0 : index
    %12 = vector.load %arg9[%c0_14, %c0_15] : memref<144x128xf32, #tpu.memory_space<vmem>>, vector<8x128xf32>
    %13 = arith.addf %11, %12 : vector<8x128xf32>
    %14 = vector.extract_strided_slice %13 {offsets = [0, 0], sizes = [8, 96], strides = [1, 1]} : vector<8x128xf32> to vector<8x96xf32>
    %15 = arith.negf %14 : vector<8x96xf32>
    %16 = math.exp %15 : vector<8x96xf32>
    %cst_16 = arith.constant 1.000000e+00 : f32
    %17 = vector.broadcast %cst_16 : f32 to vector<8x96xf32>
    %18 = arith.addf %17, %16 : vector<8x96xf32>
    %19 = arith.divf %17, %18 : vector<8x96xf32>
    %20 = vector.extract_strided_slice %13 {offsets = [0, 96], sizes = [8, 32], strides = [1, 1]} : vector<8x128xf32> to vector<8x32xf32>
    %21 = math.tanh %20 : vector<8x32xf32>
    %22 = vector.extract_strided_slice %19 {offsets = [0, 32], sizes = [8, 32], strides = [1, 1]} : vector<8x96xf32> to vector<8x32xf32>
    %23 = arith.mulf %22, %9 : vector<8x32xf32>
    %24 = vector.extract_strided_slice %19 {offsets = [0, 0], sizes = [8, 32], strides = [1, 1]} : vector<8x96xf32> to vector<8x32xf32>
    %25 = arith.mulf %24, %21 : vector<8x32xf32>
    %26 = arith.addf %23, %25 : vector<8x32xf32>
    %27 = vector.extract_strided_slice %19 {offsets = [0, 64], sizes = [8, 32], strides = [1, 1]} : vector<8x96xf32> to vector<8x32xf32>
    %28 = math.tanh %26 : vector<8x32xf32>
    %29 = arith.mulf %27, %28 : vector<8x32xf32>
    %c0_17 = arith.constant 0 : index
    %c0_18 = arith.constant 0 : index
    %c0_19 = arith.constant 0 : index
    %30 = vector.load %arg1[%c0_17, %c0_18, %c0_19] : memref<18x8x32xf32, #tpu.memory_space<vmem>>, vector<1x8x32xf32>
    %31 = vector.shape_cast %30 : vector<1x8x32xf32> to vector<8x32xf32>
    %32 = arith.subf %29, %8 : vector<8x32xf32>
    %33 = arith.mulf %31, %32 : vector<8x32xf32>
    %34 = arith.addf %8, %33 : vector<8x32xf32>
    %35 = arith.subf %26, %9 : vector<8x32xf32>
    %36 = arith.mulf %31, %35 : vector<8x32xf32>
    %37 = arith.addf %9, %36 : vector<8x32xf32>
    %38 = arith.mulf %31, %34 : vector<8x32xf32>
    %c0_20 = arith.constant 0 : index
    %c0_21 = arith.constant 0 : index
    %c0_22 = arith.constant 0 : index
    %39 = vector.load %arg7[%c0_20, %c0_21, %c0_22] : memref<18x8x32xf32, #tpu.memory_space<vmem>>, vector<1x8x32xf32>
    %40 = vector.shape_cast %39 : vector<1x8x32xf32> to vector<8x32xf32>
    %41 = vector.shape_cast %38 : vector<8x32xf32> to vector<1x8x32xf32>
    tpu.vector_store %arg7[%c0_20, %c0_21, %c0_22], %41 {strides = array<i32>} : memref<18x8x32xf32, #tpu.memory_space<vmem>>, vector<1x8x32xf32>,
    %42 = arith.truncf %34 : vector<8x32xf32> to vector<8x32xbf16>
    %cst_23 = arith.constant dense<0.000000e+00> : vector<8x128xf32>
    %43 = tpu.matmul %42, %7, %cst_23 {dimension_numbers = #tpu.dot_dimension_numbers<[1], [0], [0], [1], [0, 0, 1, 1], [], []>} : vector<8x32xbf16>, vector<32x128xbf16>, vector<8x128xf32> -> vector<8x128xf32>
    %c8 = arith.constant 8 : index
    %c0_24 = arith.constant 0 : index
    %44 = vector.load %arg9[%c8, %c0_24] : memref<144x128xf32, #tpu.memory_space<vmem>>, vector<8x128xf32>
    %45 = arith.addf %43, %44 : vector<8x128xf32>
    %46 = vector.extract_strided_slice %45 {offsets = [0, 0], sizes = [8, 96], strides = [1, 1]} : vector<8x128xf32> to vector<8x96xf32>
    %47 = arith.negf %46 : vector<8x96xf32>
    %48 = math.exp %47 : vector<8x96xf32>
    %cst_25 = arith.constant 1.000000e+00 : f32
    %49 = vector.broadcast %cst_25 : f32 to vector<8x96xf32>
    %50 = arith.addf %49, %48 : vector<8x96xf32>
    %51 = arith.divf %49, %50 : vector<8x96xf32>
    %52 = vector.extract_strided_slice %45 {offsets = [0, 96], sizes = [8, 32], strides = [1, 1]} : vector<8x128xf32> to vector<8x32xf32>
    %53 = math.tanh %52 : vector<8x32xf32>
    %54 = vector.extract_strided_slice %51 {offsets = [0, 32], sizes = [8, 32], strides = [1, 1]} : vector<8x96xf32> to vector<8x32xf32>
    %55 = arith.mulf %54, %37 : vector<8x32xf32>
    %56 = vector.extract_strided_slice %51 {offsets = [0, 0], sizes = [8, 32], strides = [1, 1]} : vector<8x96xf32> to vector<8x32xf32>
    %57 = arith.mulf %56, %53 : vector<8x32xf32>
    %58 = arith.addf %55, %57 : vector<8x32xf32>
    %59 = vector.extract_strided_slice %51 {offsets = [0, 64], sizes = [8, 32], strides = [1, 1]} : vector<8x96xf32> to vector<8x32xf32>
    %60 = math.tanh %58 : vector<8x32xf32>
    %61 = arith.mulf %59, %60 : vector<8x32xf32>
    %c1 = arith.constant 1 : index
    %c0_26 = arith.constant 0 : index
    %c0_27 = arith.constant 0 : index
    %62 = vector.load %arg1[%c1, %c0_26, %c0_27] : memref<18x8x32xf32, #tpu.memory_space<vmem>>, vector<1x8x32xf32>
    %63 = vector.shape_cast %62 : vector<1x8x32xf32> to vector<8x32xf32>
    %64 = arith.subf %61, %34 : vector<8x32xf32>
    %65 = arith.mulf %63, %64 : vector<8x32xf32>
    %66 = arith.addf %34, %65 : vector<8x32xf32>
    %67 = arith.subf %58, %37 : vector<8x32xf32>
    %68 = arith.mulf %63, %67 : vector<8x32xf32>
    %69 = arith.addf %37, %68 : vector<8x32xf32>
    %70 = arith.mulf %63, %66 : vector<8x32xf32>
    %c1_28 = arith.constant 1 : index
    %c0_29 = arith.constant 0 : index
    %c0_30 = arith.constant 0 : index
    %71 = vector.load %arg7[%c1_28, %c0_29, %c0_30] : memref<18x8x32xf32, #tpu.memory_space<vmem>>, vector<1x8x32xf32>
    %72 = vector.shape_cast %71 : vector<1x8x32xf32> to vector<8x32xf32>
    %73 = vector.shape_cast %70 : vector<8x32xf32> to vector<1x8x32xf32>
    tpu.vector_store %arg7[%c1_28, %c0_29, %c0_30], %73 {strides = array<i32>} : memref<18x8x32xf32, #tpu.memory_space<vmem>>, vector<1x8x32xf32>,
    %74 = arith.truncf %66 : vector<8x32xf32> to vector<8x32xbf16>
    %cst_31 = arith.constant dense<0.000000e+00> : vector<8x128xf32>
    %75 = tpu.matmul %74, %7, %cst_31 {dimension_numbers = #tpu.dot_dimension_numbers<[1], [0], [0], [1], [0, 0, 1, 1], [], []>} : vector<8x32xbf16>, vector<32x128xbf16>, vector<8x128xf32> -> vector<8x128xf32>
    %c16 = arith.constant 16 : index
    %c0_32 = arith.constant 0 : index
    %76 = vector.load %arg9[%c16, %c0_32] : memref<144x128xf32, #tpu.memory_space<vmem>>, vector<8x128xf32>
    %77 = arith.addf %75, %76 : vector<8x128xf32>
    %78 = vector.extract_strided_slice %77 {offsets = [0, 0], sizes = [8, 96], strides = [1, 1]} : vector<8x128xf32> to vector<8x96xf32>
    %79 = arith.negf %78 : vector<8x96xf32>
    %80 = math.exp %79 : vector<8x96xf32>
    %cst_33 = arith.constant 1.000000e+00 : f32
    %81 = vector.broadcast %cst_33 : f32 to vector<8x96xf32>
    %82 = arith.addf %81, %80 : vector<8x96xf32>
    %83 = arith.divf %81, %82 : vector<8x96xf32>
    %84 = vector.extract_strided_slice %77 {offsets = [0, 96], sizes = [8, 32], strides = [1, 1]} : vector<8x128xf32> to vector<8x32xf32>
    %85 = math.tanh %84 : vector<8x32xf32>
    %86 = vector.extract_strided_slice %83 {offsets = [0, 32], sizes = [8, 32], strides = [1, 1]} : vector<8x96xf32> to vector<8x32xf32>
    %87 = arith.mulf %86, %69 : vector<8x32xf32>
    %88 = vector.extract_strided_slice %83 {offsets = [0, 0], sizes = [8, 32], strides = [1, 1]} : vector<8x96xf32> to vector<8x32xf32>
    %89 = arith.mulf %88, %85 : vector<8x32xf32>
    %90 = arith.addf %87, %89 : vector<8x32xf32>
    %91 = vector.extract_strided_slice %83 {offsets = [0, 64], sizes = [8, 32], strides = [1, 1]} : vector<8x96xf32> to vector<8x32xf32>
    %92 = math.tanh %90 : vector<8x32xf32>
    %93 = arith.mulf %91, %92 : vector<8x32xf32>
    %c2 = arith.constant 2 : index
    %c0_34 = arith.constant 0 : index
    %c0_35 = arith.constant 0 : index
    %94 = vector.load %arg1[%c2, %c0_34, %c0_35] : memref<18x8x32xf32, #tpu.memory_space<vmem>>, vector<1x8x32xf32>
    %95 = vector.shape_cast %94 : vector<1x8x32xf32> to vector<8x32xf32>
    %96 = arith.subf %93, %66 : vector<8x32xf32>
    %97 = arith.mulf %95, %96 : vector<8x32xf32>
    %98 = arith.addf %66, %97 : vector<8x32xf32>
    %99 = arith.subf %90, %69 : vector<8x32xf32>
    %100 = arith.mulf %95, %99 : vector<8x32xf32>
    %101 = arith.addf %69, %100 : vector<8x32xf32>
    %102 = arith.mulf %95, %98 : vector<8x32xf32>
    %c2_36 = arith.constant 2 : index
    %c0_37 = arith.constant 0 : index
    %c0_38 = arith.constant 0 : index
    %103 = vector.load %arg7[%c2_36, %c0_37, %c0_38] : memref<18x8x32xf32, #tpu.memory_space<vmem>>, vector<1x8x32xf32>
    %104 = vector.shape_cast %103 : vector<1x8x32xf32> to vector<8x32xf32>
    %105 = vector.shape_cast %102 : vector<8x32xf32> to vector<1x8x32xf32>
    tpu.vector_store %arg7[%c2_36, %c0_37, %c0_38], %105 {strides = array<i32>} : memref<18x8x32xf32, #tpu.memory_space<vmem>>, vector<1x8x32xf32>,
    %106 = arith.truncf %98 : vector<8x32xf32> to vector<8x32xbf16>
    %cst_39 = arith.constant dense<0.000000e+00> : vector<8x128xf32>
    %107 = tpu.matmul %106, %7, %cst_39 {dimension_numbers = #tpu.dot_dimension_numbers<[1], [0], [0], [1], [0, 0, 1, 1], [], []>} : vector<8x32xbf16>, vector<32x128xbf16>, vector<8x128xf32> -> vector<8x128xf32>
    %c24 = arith.constant 24 : index
    %c0_40 = arith.constant 0 : index
    %108 = vector.load %arg9[%c24, %c0_40] : memref<144x128xf32, #tpu.memory_space<vmem>>, vector<8x128xf32>
    %109 = arith.addf %107, %108 : vector<8x128xf32>
    %110 = vector.extract_strided_slice %109 {offsets = [0, 0], sizes = [8, 96], strides = [1, 1]} : vector<8x128xf32> to vector<8x96xf32>
    %111 = arith.negf %110 : vector<8x96xf32>
    %112 = math.exp %111 : vector<8x96xf32>
    %cst_41 = arith.constant 1.000000e+00 : f32
    %113 = vector.broadcast %cst_41 : f32 to vector<8x96xf32>
    %114 = arith.addf %113, %112 : vector<8x96xf32>
    %115 = arith.divf %113, %114 : vector<8x96xf32>
    %116 = vector.extract_strided_slice %109 {offsets = [0, 96], sizes = [8, 32], strides = [1, 1]} : vector<8x128xf32> to vector<8x32xf32>
    %117 = math.tanh %116 : vector<8x32xf32>
    %118 = vector.extract_strided_slice %115 {offsets = [0, 32], sizes = [8, 32], strides = [1, 1]} : vector<8x96xf32> to vector<8x32xf32>
    %119 = arith.mulf %118, %101 : vector<8x32xf32>
    %120 = vector.extract_strided_slice %115 {offsets = [0, 0], sizes = [8, 32], strides = [1, 1]} : vector<8x96xf32> to vector<8x32xf32>
    %121 = arith.mulf %120, %117 : vector<8x32xf32>
    %122 = arith.addf %119, %121 : vector<8x32xf32>
    %123 = vector.extract_strided_slice %115 {offsets = [0, 64], sizes = [8, 32], strides = [1, 1]} : vector<8x96xf32> to vector<8x32xf32>
    %124 = math.tanh %122 : vector<8x32xf32>
    %125 = arith.mulf %123, %124 : vector<8x32xf32>
    %c3 = arith.constant 3 : index
    %c0_42 = arith.constant 0 : index
    %c0_43 = arith.constant 0 : index
    %126 = vector.load %arg1[%c3, %c0_42, %c0_43] : memref<18x8x32xf32, #tpu.memory_space<vmem>>, vector<1x8x32xf32>
    %127 = vector.shape_cast %126 : vector<1x8x32xf32> to vector<8x32xf32>
    %128 = arith.subf %125, %98 : vector<8x32xf32>
    %129 = arith.mulf %127, %128 : vector<8x32xf32>
    %130 = arith.addf %98, %129 : vector<8x32xf32>
    %131 = arith.subf %122, %101 : vector<8x32xf32>
    %132 = arith.mulf %127, %131 : vector<8x32xf32>
    %133 = arith.addf %101, %132 : vector<8x32xf32>
    %134 = arith.mulf %127, %130 : vector<8x32xf32>
    %c3_44 = arith.constant 3 : index
    %c0_45 = arith.constant 0 : index
    %c0_46 = arith.constant 0 : index
    %135 = vector.load %arg7[%c3_44, %c0_45, %c0_46] : memref<18x8x32xf32, #tpu.memory_space<vmem>>, vector<1x8x32xf32>
    %136 = vector.shape_cast %135 : vector<1x8x32xf32> to vector<8x32xf32>
    %137 = vector.shape_cast %134 : vector<8x32xf32> to vector<1x8x32xf32>
    tpu.vector_store %arg7[%c3_44, %c0_45, %c0_46], %137 {strides = array<i32>} : memref<18x8x32xf32, #tpu.memory_space<vmem>>, vector<1x8x32xf32>,
    %138 = arith.truncf %130 : vector<8x32xf32> to vector<8x32xbf16>
    %cst_47 = arith.constant dense<0.000000e+00> : vector<8x128xf32>
    %139 = tpu.matmul %138, %7, %cst_47 {dimension_numbers = #tpu.dot_dimension_numbers<[1], [0], [0], [1], [0, 0, 1, 1], [], []>} : vector<8x32xbf16>, vector<32x128xbf16>, vector<8x128xf32> -> vector<8x128xf32>
    %c32 = arith.constant 32 : index
    %c0_48 = arith.constant 0 : index
    %140 = vector.load %arg9[%c32, %c0_48] : memref<144x128xf32, #tpu.memory_space<vmem>>, vector<8x128xf32>
    %141 = arith.addf %139, %140 : vector<8x128xf32>
    %142 = vector.extract_strided_slice %141 {offsets = [0, 0], sizes = [8, 96], strides = [1, 1]} : vector<8x128xf32> to vector<8x96xf32>
    %143 = arith.negf %142 : vector<8x96xf32>
    %144 = math.exp %143 : vector<8x96xf32>
    %cst_49 = arith.constant 1.000000e+00 : f32
    %145 = vector.broadcast %cst_49 : f32 to vector<8x96xf32>
    %146 = arith.addf %145, %144 : vector<8x96xf32>
    %147 = arith.divf %145, %146 : vector<8x96xf32>
    %148 = vector.extract_strided_slice %141 {offsets = [0, 96], sizes = [8, 32], strides = [1, 1]} : vector<8x128xf32> to vector<8x32xf32>
    %149 = math.tanh %148 : vector<8x32xf32>
    %150 = vector.extract_strided_slice %147 {offsets = [0, 32], sizes = [8, 32], strides = [1, 1]} : vector<8x96xf32> to vector<8x32xf32>
    %151 = arith.mulf %150, %133 : vector<8x32xf32>
    %152 = vector.extract_strided_slice %147 {offsets = [0, 0], sizes = [8, 32], strides = [1, 1]} : vector<8x96xf32> to vector<8x32xf32>
    %153 = arith.mulf %152, %149 : vector<8x32xf32>
    %154 = arith.addf %151, %153 : vector<8x32xf32>
    %155 = vector.extract_strided_slice %147 {offsets = [0, 64], sizes = [8, 32], strides = [1, 1]} : vector<8x96xf32> to vector<8x32xf32>
    %156 = math.tanh %154 : vector<8x32xf32>
    %157 = arith.mulf %155, %156 : vector<8x32xf32>
    %c4 = arith.constant 4 : index
    %c0_50 = arith.constant 0 : index
    %c0_51 = arith.constant 0 : index
    %158 = vector.load %arg1[%c4, %c0_50, %c0_51] : memref<18x8x32xf32, #tpu.memory_space<vmem>>, vector<1x8x32xf32>
    %159 = vector.shape_cast %158 : vector<1x8x32xf32> to vector<8x32xf32>
    %160 = arith.subf %157, %130 : vector<8x32xf32>
    %161 = arith.mulf %159, %160 : vector<8x32xf32>
    %162 = arith.addf %130, %161 : vector<8x32xf32>
    %163 = arith.subf %154, %133 : vector<8x32xf32>
    %164 = arith.mulf %159, %163 : vector<8x32xf32>
    %165 = arith.addf %133, %164 : vector<8x32xf32>
    %166 = arith.mulf %159, %162 : vector<8x32xf32>
    %c4_52 = arith.constant 4 : index
    %c0_53 = arith.constant 0 : index
    %c0_54 = arith.constant 0 : index
    %167 = vector.load %arg7[%c4_52, %c0_53, %c0_54] : memref<18x8x32xf32, #tpu.memory_space<vmem>>, vector<1x8x32xf32>
    %168 = vector.shape_cast %167 : vector<1x8x32xf32> to vector<8x32xf32>
    %169 = vector.shape_cast %166 : vector<8x32xf32> to vector<1x8x32xf32>
    tpu.vector_store %arg7[%c4_52, %c0_53, %c0_54], %169 {strides = array<i32>} : memref<18x8x32xf32, #tpu.memory_space<vmem>>, vector<1x8x32xf32>,
    %170 = arith.truncf %162 : vector<8x32xf32> to vector<8x32xbf16>
    %cst_55 = arith.constant dense<0.000000e+00> : vector<8x128xf32>
    %171 = tpu.matmul %170, %7, %cst_55 {dimension_numbers = #tpu.dot_dimension_numbers<[1], [0], [0], [1], [0, 0, 1, 1], [], []>} : vector<8x32xbf16>, vector<32x128xbf16>, vector<8x128xf32> -> vector<8x128xf32>
    %c40 = arith.constant 40 : index
    %c0_56 = arith.constant 0 : index
    %172 = vector.load %arg9[%c40, %c0_56] : memref<144x128xf32, #tpu.memory_space<vmem>>, vector<8x128xf32>
    %173 = arith.addf %171, %172 : vector<8x128xf32>
    %174 = vector.extract_strided_slice %173 {offsets = [0, 0], sizes = [8, 96], strides = [1, 1]} : vector<8x128xf32> to vector<8x96xf32>
    %175 = arith.negf %174 : vector<8x96xf32>
    %176 = math.exp %175 : vector<8x96xf32>
    %cst_57 = arith.constant 1.000000e+00 : f32
    %177 = vector.broadcast %cst_57 : f32 to vector<8x96xf32>
    %178 = arith.addf %177, %176 : vector<8x96xf32>
    %179 = arith.divf %177, %178 : vector<8x96xf32>
    %180 = vector.extract_strided_slice %173 {offsets = [0, 96], sizes = [8, 32], strides = [1, 1]} : vector<8x128xf32> to vector<8x32xf32>
    %181 = math.tanh %180 : vector<8x32xf32>
    %182 = vector.extract_strided_slice %179 {offsets = [0, 32], sizes = [8, 32], strides = [1, 1]} : vector<8x96xf32> to vector<8x32xf32>
    %183 = arith.mulf %182, %165 : vector<8x32xf32>
    %184 = vector.extract_strided_slice %179 {offsets = [0, 0], sizes = [8, 32], strides = [1, 1]} : vector<8x96xf32> to vector<8x32xf32>
    %185 = arith.mulf %184, %181 : vector<8x32xf32>
    %186 = arith.addf %183, %185 : vector<8x32xf32>
    %187 = vector.extract_strided_slice %179 {offsets = [0, 64], sizes = [8, 32], strides = [1, 1]} : vector<8x96xf32> to vector<8x32xf32>
    %188 = math.tanh %186 : vector<8x32xf32>
    %189 = arith.mulf %187, %188 : vector<8x32xf32>
    %c5 = arith.constant 5 : index
    %c0_58 = arith.constant 0 : index
    %c0_59 = arith.constant 0 : index
    %190 = vector.load %arg1[%c5, %c0_58, %c0_59] : memref<18x8x32xf32, #tpu.memory_space<vmem>>, vector<1x8x32xf32>
    %191 = vector.shape_cast %190 : vector<1x8x32xf32> to vector<8x32xf32>
    %192 = arith.subf %189, %162 : vector<8x32xf32>
    %193 = arith.mulf %191, %192 : vector<8x32xf32>
    %194 = arith.addf %162, %193 : vector<8x32xf32>
    %195 = arith.subf %186, %165 : vector<8x32xf32>
    %196 = arith.mulf %191, %195 : vector<8x32xf32>
    %197 = arith.addf %165, %196 : vector<8x32xf32>
    %198 = arith.mulf %191, %194 : vector<8x32xf32>
    %c5_60 = arith.constant 5 : index
    %c0_61 = arith.constant 0 : index
    %c0_62 = arith.constant 0 : index
    %199 = vector.load %arg7[%c5_60, %c0_61, %c0_62] : memref<18x8x32xf32, #tpu.memory_space<vmem>>, vector<1x8x32xf32>
    %200 = vector.shape_cast %199 : vector<1x8x32xf32> to vector<8x32xf32>
    %201 = vector.shape_cast %198 : vector<8x32xf32> to vector<1x8x32xf32>
    tpu.vector_store %arg7[%c5_60, %c0_61, %c0_62], %201 {strides = array<i32>} : memref<18x8x32xf32, #tpu.memory_space<vmem>>, vector<1x8x32xf32>,
    %202 = arith.truncf %194 : vector<8x32xf32> to vector<8x32xbf16>
    %cst_63 = arith.constant dense<0.000000e+00> : vector<8x128xf32>
    %203 = tpu.matmul %202, %7, %cst_63 {dimension_numbers = #tpu.dot_dimension_numbers<[1], [0], [0], [1], [0, 0, 1, 1], [], []>} : vector<8x32xbf16>, vector<32x128xbf16>, vector<8x128xf32> -> vector<8x128xf32>
    %c48 = arith.constant 48 : index
    %c0_64 = arith.constant 0 : index
    %204 = vector.load %arg9[%c48, %c0_64] : memref<144x128xf32, #tpu.memory_space<vmem>>, vector<8x128xf32>
    %205 = arith.addf %203, %204 : vector<8x128xf32>
    %206 = vector.extract_strided_slice %205 {offsets = [0, 0], sizes = [8, 96], strides = [1, 1]} : vector<8x128xf32> to vector<8x96xf32>
    %207 = arith.negf %206 : vector<8x96xf32>
    %208 = math.exp %207 : vector<8x96xf32>
    %cst_65 = arith.constant 1.000000e+00 : f32
    %209 = vector.broadcast %cst_65 : f32 to vector<8x96xf32>
    %210 = arith.addf %209, %208 : vector<8x96xf32>
    %211 = arith.divf %209, %210 : vector<8x96xf32>
    %212 = vector.extract_strided_slice %205 {offsets = [0, 96], sizes = [8, 32], strides = [1, 1]} : vector<8x128xf32> to vector<8x32xf32>
    %213 = math.tanh %212 : vector<8x32xf32>
    %214 = vector.extract_strided_slice %211 {offsets = [0, 32], sizes = [8, 32], strides = [1, 1]} : vector<8x96xf32> to vector<8x32xf32>
    %215 = arith.mulf %214, %197 : vector<8x32xf32>
    %216 = vector.extract_strided_slice %211 {offsets = [0, 0], sizes = [8, 32], strides = [1, 1]} : vector<8x96xf32> to vector<8x32xf32>
    %217 = arith.mulf %216, %213 : vector<8x32xf32>
    %218 = arith.addf %215, %217 : vector<8x32xf32>
    %219 = vector.extract_strided_slice %211 {offsets = [0, 64], sizes = [8, 32], strides = [1, 1]} : vector<8x96xf32> to vector<8x32xf32>
    %220 = math.tanh %218 : vector<8x32xf32>
    %221 = arith.mulf %219, %220 : vector<8x32xf32>
    %c6 = arith.constant 6 : index
    %c0_66 = arith.constant 0 : index
    %c0_67 = arith.constant 0 : index
    %222 = vector.load %arg1[%c6, %c0_66, %c0_67] : memref<18x8x32xf32, #tpu.memory_space<vmem>>, vector<1x8x32xf32>
    %223 = vector.shape_cast %222 : vector<1x8x32xf32> to vector<8x32xf32>
    %224 = arith.subf %221, %194 : vector<8x32xf32>
    %225 = arith.mulf %223, %224 : vector<8x32xf32>
    %226 = arith.addf %194, %225 : vector<8x32xf32>
    %227 = arith.subf %218, %197 : vector<8x32xf32>
    %228 = arith.mulf %223, %227 : vector<8x32xf32>
    %229 = arith.addf %197, %228 : vector<8x32xf32>
    %230 = arith.mulf %223, %226 : vector<8x32xf32>
    %c6_68 = arith.constant 6 : index
    %c0_69 = arith.constant 0 : index
    %c0_70 = arith.constant 0 : index
    %231 = vector.load %arg7[%c6_68, %c0_69, %c0_70] : memref<18x8x32xf32, #tpu.memory_space<vmem>>, vector<1x8x32xf32>
    %232 = vector.shape_cast %231 : vector<1x8x32xf32> to vector<8x32xf32>
    %233 = vector.shape_cast %230 : vector<8x32xf32> to vector<1x8x32xf32>
    tpu.vector_store %arg7[%c6_68, %c0_69, %c0_70], %233 {strides = array<i32>} : memref<18x8x32xf32, #tpu.memory_space<vmem>>, vector<1x8x32xf32>,
    %234 = arith.truncf %226 : vector<8x32xf32> to vector<8x32xbf16>
    %cst_71 = arith.constant dense<0.000000e+00> : vector<8x128xf32>
    %235 = tpu.matmul %234, %7, %cst_71 {dimension_numbers = #tpu.dot_dimension_numbers<[1], [0], [0], [1], [0, 0, 1, 1], [], []>} : vector<8x32xbf16>, vector<32x128xbf16>, vector<8x128xf32> -> vector<8x128xf32>
    %c56 = arith.constant 56 : index
    %c0_72 = arith.constant 0 : index
    %236 = vector.load %arg9[%c56, %c0_72] : memref<144x128xf32, #tpu.memory_space<vmem>>, vector<8x128xf32>
    %237 = arith.addf %235, %236 : vector<8x128xf32>
    %238 = vector.extract_strided_slice %237 {offsets = [0, 0], sizes = [8, 96], strides = [1, 1]} : vector<8x128xf32> to vector<8x96xf32>
    %239 = arith.negf %238 : vector<8x96xf32>
    %240 = math.exp %239 : vector<8x96xf32>
    %cst_73 = arith.constant 1.000000e+00 : f32
    %241 = vector.broadcast %cst_73 : f32 to vector<8x96xf32>
    %242 = arith.addf %241, %240 : vector<8x96xf32>
    %243 = arith.divf %241, %242 : vector<8x96xf32>
    %244 = vector.extract_strided_slice %237 {offsets = [0, 96], sizes = [8, 32], strides = [1, 1]} : vector<8x128xf32> to vector<8x32xf32>
    %245 = math.tanh %244 : vector<8x32xf32>
    %246 = vector.extract_strided_slice %243 {offsets = [0, 32], sizes = [8, 32], strides = [1, 1]} : vector<8x96xf32> to vector<8x32xf32>
    %247 = arith.mulf %246, %229 : vector<8x32xf32>
    %248 = vector.extract_strided_slice %243 {offsets = [0, 0], sizes = [8, 32], strides = [1, 1]} : vector<8x96xf32> to vector<8x32xf32>
    %249 = arith.mulf %248, %245 : vector<8x32xf32>
    %250 = arith.addf %247, %249 : vector<8x32xf32>
    %251 = vector.extract_strided_slice %243 {offsets = [0, 64], sizes = [8, 32], strides = [1, 1]} : vector<8x96xf32> to vector<8x32xf32>
    %252 = math.tanh %250 : vector<8x32xf32>
    %253 = arith.mulf %251, %252 : vector<8x32xf32>
    %c7 = arith.constant 7 : index
    %c0_74 = arith.constant 0 : index
    %c0_75 = arith.constant 0 : index
    %254 = vector.load %arg1[%c7, %c0_74, %c0_75] : memref<18x8x32xf32, #tpu.memory_space<vmem>>, vector<1x8x32xf32>
    %255 = vector.shape_cast %254 : vector<1x8x32xf32> to vector<8x32xf32>
    %256 = arith.subf %253, %226 : vector<8x32xf32>
    %257 = arith.mulf %255, %256 : vector<8x32xf32>
    %258 = arith.addf %226, %257 : vector<8x32xf32>
    %259 = arith.subf %250, %229 : vector<8x32xf32>
    %260 = arith.mulf %255, %259 : vector<8x32xf32>
    %261 = arith.addf %229, %260 : vector<8x32xf32>
    %262 = arith.mulf %255, %258 : vector<8x32xf32>
    %c7_76 = arith.constant 7 : index
    %c0_77 = arith.constant 0 : index
    %c0_78 = arith.constant 0 : index
    %263 = vector.load %arg7[%c7_76, %c0_77, %c0_78] : memref<18x8x32xf32, #tpu.memory_space<vmem>>, vector<1x8x32xf32>
    %264 = vector.shape_cast %263 : vector<1x8x32xf32> to vector<8x32xf32>
    %265 = vector.shape_cast %262 : vector<8x32xf32> to vector<1x8x32xf32>
    tpu.vector_store %arg7[%c7_76, %c0_77, %c0_78], %265 {strides = array<i32>} : memref<18x8x32xf32, #tpu.memory_space<vmem>>, vector<1x8x32xf32>,
    %266 = arith.truncf %258 : vector<8x32xf32> to vector<8x32xbf16>
    %cst_79 = arith.constant dense<0.000000e+00> : vector<8x128xf32>
    %267 = tpu.matmul %266, %7, %cst_79 {dimension_numbers = #tpu.dot_dimension_numbers<[1], [0], [0], [1], [0, 0, 1, 1], [], []>} : vector<8x32xbf16>, vector<32x128xbf16>, vector<8x128xf32> -> vector<8x128xf32>
    %c64 = arith.constant 64 : index
    %c0_80 = arith.constant 0 : index
    %268 = vector.load %arg9[%c64, %c0_80] : memref<144x128xf32, #tpu.memory_space<vmem>>, vector<8x128xf32>
    %269 = arith.addf %267, %268 : vector<8x128xf32>
    %270 = vector.extract_strided_slice %269 {offsets = [0, 0], sizes = [8, 96], strides = [1, 1]} : vector<8x128xf32> to vector<8x96xf32>
    %271 = arith.negf %270 : vector<8x96xf32>
    %272 = math.exp %271 : vector<8x96xf32>
    %cst_81 = arith.constant 1.000000e+00 : f32
    %273 = vector.broadcast %cst_81 : f32 to vector<8x96xf32>
    %274 = arith.addf %273, %272 : vector<8x96xf32>
    %275 = arith.divf %273, %274 : vector<8x96xf32>
    %276 = vector.extract_strided_slice %269 {offsets = [0, 96], sizes = [8, 32], strides = [1, 1]} : vector<8x128xf32> to vector<8x32xf32>
    %277 = math.tanh %276 : vector<8x32xf32>
    %278 = vector.extract_strided_slice %275 {offsets = [0, 32], sizes = [8, 32], strides = [1, 1]} : vector<8x96xf32> to vector<8x32xf32>
    %279 = arith.mulf %278, %261 : vector<8x32xf32>
    %280 = vector.extract_strided_slice %275 {offsets = [0, 0], sizes = [8, 32], strides = [1, 1]} : vector<8x96xf32> to vector<8x32xf32>
    %281 = arith.mulf %280, %277 : vector<8x32xf32>
    %282 = arith.addf %279, %281 : vector<8x32xf32>
    %283 = vector.extract_strided_slice %275 {offsets = [0, 64], sizes = [8, 32], strides = [1, 1]} : vector<8x96xf32> to vector<8x32xf32>
    %284 = math.tanh %282 : vector<8x32xf32>
    %285 = arith.mulf %283, %284 : vector<8x32xf32>
    %c8_82 = arith.constant 8 : index
    %c0_83 = arith.constant 0 : index
    %c0_84 = arith.constant 0 : index
    %286 = vector.load %arg1[%c8_82, %c0_83, %c0_84] : memref<18x8x32xf32, #tpu.memory_space<vmem>>, vector<1x8x32xf32>
    %287 = vector.shape_cast %286 : vector<1x8x32xf32> to vector<8x32xf32>
    %288 = arith.subf %285, %258 : vector<8x32xf32>
    %289 = arith.mulf %287, %288 : vector<8x32xf32>
    %290 = arith.addf %258, %289 : vector<8x32xf32>
    %291 = arith.subf %282, %261 : vector<8x32xf32>
    %292 = arith.mulf %287, %291 : vector<8x32xf32>
    %293 = arith.addf %261, %292 : vector<8x32xf32>
    %294 = arith.mulf %287, %290 : vector<8x32xf32>
    %c8_85 = arith.constant 8 : index
    %c0_86 = arith.constant 0 : index
    %c0_87 = arith.constant 0 : index
    %295 = vector.load %arg7[%c8_85, %c0_86, %c0_87] : memref<18x8x32xf32, #tpu.memory_space<vmem>>, vector<1x8x32xf32>
    %296 = vector.shape_cast %295 : vector<1x8x32xf32> to vector<8x32xf32>
    %297 = vector.shape_cast %294 : vector<8x32xf32> to vector<1x8x32xf32>
    tpu.vector_store %arg7[%c8_85, %c0_86, %c0_87], %297 {strides = array<i32>} : memref<18x8x32xf32, #tpu.memory_space<vmem>>, vector<1x8x32xf32>,
    %298 = arith.truncf %290 : vector<8x32xf32> to vector<8x32xbf16>
    %cst_88 = arith.constant dense<0.000000e+00> : vector<8x128xf32>
    %299 = tpu.matmul %298, %7, %cst_88 {dimension_numbers = #tpu.dot_dimension_numbers<[1], [0], [0], [1], [0, 0, 1, 1], [], []>} : vector<8x32xbf16>, vector<32x128xbf16>, vector<8x128xf32> -> vector<8x128xf32>
    %c72 = arith.constant 72 : index
    %c0_89 = arith.constant 0 : index
    %300 = vector.load %arg9[%c72, %c0_89] : memref<144x128xf32, #tpu.memory_space<vmem>>, vector<8x128xf32>
    %301 = arith.addf %299, %300 : vector<8x128xf32>
    %302 = vector.extract_strided_slice %301 {offsets = [0, 0], sizes = [8, 96], strides = [1, 1]} : vector<8x128xf32> to vector<8x96xf32>
    %303 = arith.negf %302 : vector<8x96xf32>
    %304 = math.exp %303 : vector<8x96xf32>
    %cst_90 = arith.constant 1.000000e+00 : f32
    %305 = vector.broadcast %cst_90 : f32 to vector<8x96xf32>
    %306 = arith.addf %305, %304 : vector<8x96xf32>
    %307 = arith.divf %305, %306 : vector<8x96xf32>
    %308 = vector.extract_strided_slice %301 {offsets = [0, 96], sizes = [8, 32], strides = [1, 1]} : vector<8x128xf32> to vector<8x32xf32>
    %309 = math.tanh %308 : vector<8x32xf32>
    %310 = vector.extract_strided_slice %307 {offsets = [0, 32], sizes = [8, 32], strides = [1, 1]} : vector<8x96xf32> to vector<8x32xf32>
    %311 = arith.mulf %310, %293 : vector<8x32xf32>
    %312 = vector.extract_strided_slice %307 {offsets = [0, 0], sizes = [8, 32], strides = [1, 1]} : vector<8x96xf32> to vector<8x32xf32>
    %313 = arith.mulf %312, %309 : vector<8x32xf32>
    %314 = arith.addf %311, %313 : vector<8x32xf32>
    %315 = vector.extract_strided_slice %307 {offsets = [0, 64], sizes = [8, 32], strides = [1, 1]} : vector<8x96xf32> to vector<8x32xf32>
    %316 = math.tanh %314 : vector<8x32xf32>
    %317 = arith.mulf %315, %316 : vector<8x32xf32>
    %c9 = arith.constant 9 : index
    %c0_91 = arith.constant 0 : index
    %c0_92 = arith.constant 0 : index
    %318 = vector.load %arg1[%c9, %c0_91, %c0_92] : memref<18x8x32xf32, #tpu.memory_space<vmem>>, vector<1x8x32xf32>
    %319 = vector.shape_cast %318 : vector<1x8x32xf32> to vector<8x32xf32>
    %320 = arith.subf %317, %290 : vector<8x32xf32>
    %321 = arith.mulf %319, %320 : vector<8x32xf32>
    %322 = arith.addf %290, %321 : vector<8x32xf32>
    %323 = arith.subf %314, %293 : vector<8x32xf32>
    %324 = arith.mulf %319, %323 : vector<8x32xf32>
    %325 = arith.addf %293, %324 : vector<8x32xf32>
    %326 = arith.mulf %319, %322 : vector<8x32xf32>
    %c9_93 = arith.constant 9 : index
    %c0_94 = arith.constant 0 : index
    %c0_95 = arith.constant 0 : index
    %327 = vector.load %arg7[%c9_93, %c0_94, %c0_95] : memref<18x8x32xf32, #tpu.memory_space<vmem>>, vector<1x8x32xf32>
    %328 = vector.shape_cast %327 : vector<1x8x32xf32> to vector<8x32xf32>
    %329 = vector.shape_cast %326 : vector<8x32xf32> to vector<1x8x32xf32>
    tpu.vector_store %arg7[%c9_93, %c0_94, %c0_95], %329 {strides = array<i32>} : memref<18x8x32xf32, #tpu.memory_space<vmem>>, vector<1x8x32xf32>,
    %330 = arith.truncf %322 : vector<8x32xf32> to vector<8x32xbf16>
    %cst_96 = arith.constant dense<0.000000e+00> : vector<8x128xf32>
    %331 = tpu.matmul %330, %7, %cst_96 {dimension_numbers = #tpu.dot_dimension_numbers<[1], [0], [0], [1], [0, 0, 1, 1], [], []>} : vector<8x32xbf16>, vector<32x128xbf16>, vector<8x128xf32> -> vector<8x128xf32>
    %c80 = arith.constant 80 : index
    %c0_97 = arith.constant 0 : index
    %332 = vector.load %arg9[%c80, %c0_97] : memref<144x128xf32, #tpu.memory_space<vmem>>, vector<8x128xf32>
    %333 = arith.addf %331, %332 : vector<8x128xf32>
    %334 = vector.extract_strided_slice %333 {offsets = [0, 0], sizes = [8, 96], strides = [1, 1]} : vector<8x128xf32> to vector<8x96xf32>
    %335 = arith.negf %334 : vector<8x96xf32>
    %336 = math.exp %335 : vector<8x96xf32>
    %cst_98 = arith.constant 1.000000e+00 : f32
    %337 = vector.broadcast %cst_98 : f32 to vector<8x96xf32>
    %338 = arith.addf %337, %336 : vector<8x96xf32>
    %339 = arith.divf %337, %338 : vector<8x96xf32>
    %340 = vector.extract_strided_slice %333 {offsets = [0, 96], sizes = [8, 32], strides = [1, 1]} : vector<8x128xf32> to vector<8x32xf32>
    %341 = math.tanh %340 : vector<8x32xf32>
    %342 = vector.extract_strided_slice %339 {offsets = [0, 32], sizes = [8, 32], strides = [1, 1]} : vector<8x96xf32> to vector<8x32xf32>
    %343 = arith.mulf %342, %325 : vector<8x32xf32>
    %344 = vector.extract_strided_slice %339 {offsets = [0, 0], sizes = [8, 32], strides = [1, 1]} : vector<8x96xf32> to vector<8x32xf32>
    %345 = arith.mulf %344, %341 : vector<8x32xf32>
    %346 = arith.addf %343, %345 : vector<8x32xf32>
    %347 = vector.extract_strided_slice %339 {offsets = [0, 64], sizes = [8, 32], strides = [1, 1]} : vector<8x96xf32> to vector<8x32xf32>
    %348 = math.tanh %346 : vector<8x32xf32>
    %349 = arith.mulf %347, %348 : vector<8x32xf32>
    %c10 = arith.constant 10 : index
    %c0_99 = arith.constant 0 : index
    %c0_100 = arith.constant 0 : index
    %350 = vector.load %arg1[%c10, %c0_99, %c0_100] : memref<18x8x32xf32, #tpu.memory_space<vmem>>, vector<1x8x32xf32>
    %351 = vector.shape_cast %350 : vector<1x8x32xf32> to vector<8x32xf32>
    %352 = arith.subf %349, %322 : vector<8x32xf32>
    %353 = arith.mulf %351, %352 : vector<8x32xf32>
    %354 = arith.addf %322, %353 : vector<8x32xf32>
    %355 = arith.subf %346, %325 : vector<8x32xf32>
    %356 = arith.mulf %351, %355 : vector<8x32xf32>
    %357 = arith.addf %325, %356 : vector<8x32xf32>
    %358 = arith.mulf %351, %354 : vector<8x32xf32>
    %c10_101 = arith.constant 10 : index
    %c0_102 = arith.constant 0 : index
    %c0_103 = arith.constant 0 : index
    %359 = vector.load %arg7[%c10_101, %c0_102, %c0_103] : memref<18x8x32xf32, #tpu.memory_space<vmem>>, vector<1x8x32xf32>
    %360 = vector.shape_cast %359 : vector<1x8x32xf32> to vector<8x32xf32>
    %361 = vector.shape_cast %358 : vector<8x32xf32> to vector<1x8x32xf32>
    tpu.vector_store %arg7[%c10_101, %c0_102, %c0_103], %361 {strides = array<i32>} : memref<18x8x32xf32, #tpu.memory_space<vmem>>, vector<1x8x32xf32>,
    %362 = arith.truncf %354 : vector<8x32xf32> to vector<8x32xbf16>
    %cst_104 = arith.constant dense<0.000000e+00> : vector<8x128xf32>
    %363 = tpu.matmul %362, %7, %cst_104 {dimension_numbers = #tpu.dot_dimension_numbers<[1], [0], [0], [1], [0, 0, 1, 1], [], []>} : vector<8x32xbf16>, vector<32x128xbf16>, vector<8x128xf32> -> vector<8x128xf32>
    %c88 = arith.constant 88 : index
    %c0_105 = arith.constant 0 : index
    %364 = vector.load %arg9[%c88, %c0_105] : memref<144x128xf32, #tpu.memory_space<vmem>>, vector<8x128xf32>
    %365 = arith.addf %363, %364 : vector<8x128xf32>
    %366 = vector.extract_strided_slice %365 {offsets = [0, 0], sizes = [8, 96], strides = [1, 1]} : vector<8x128xf32> to vector<8x96xf32>
    %367 = arith.negf %366 : vector<8x96xf32>
    %368 = math.exp %367 : vector<8x96xf32>
    %cst_106 = arith.constant 1.000000e+00 : f32
    %369 = vector.broadcast %cst_106 : f32 to vector<8x96xf32>
    %370 = arith.addf %369, %368 : vector<8x96xf32>
    %371 = arith.divf %369, %370 : vector<8x96xf32>
    %372 = vector.extract_strided_slice %365 {offsets = [0, 96], sizes = [8, 32], strides = [1, 1]} : vector<8x128xf32> to vector<8x32xf32>
    %373 = math.tanh %372 : vector<8x32xf32>
    %374 = vector.extract_strided_slice %371 {offsets = [0, 32], sizes = [8, 32], strides = [1, 1]} : vector<8x96xf32> to vector<8x32xf32>
    %375 = arith.mulf %374, %357 : vector<8x32xf32>
    %376 = vector.extract_strided_slice %371 {offsets = [0, 0], sizes = [8, 32], strides = [1, 1]} : vector<8x96xf32> to vector<8x32xf32>
    %377 = arith.mulf %376, %373 : vector<8x32xf32>
    %378 = arith.addf %375, %377 : vector<8x32xf32>
    %379 = vector.extract_strided_slice %371 {offsets = [0, 64], sizes = [8, 32], strides = [1, 1]} : vector<8x96xf32> to vector<8x32xf32>
    %380 = math.tanh %378 : vector<8x32xf32>
    %381 = arith.mulf %379, %380 : vector<8x32xf32>
    %c11 = arith.constant 11 : index
    %c0_107 = arith.constant 0 : index
    %c0_108 = arith.constant 0 : index
    %382 = vector.load %arg1[%c11, %c0_107, %c0_108] : memref<18x8x32xf32, #tpu.memory_space<vmem>>, vector<1x8x32xf32>
    %383 = vector.shape_cast %382 : vector<1x8x32xf32> to vector<8x32xf32>
    %384 = arith.subf %381, %354 : vector<8x32xf32>
    %385 = arith.mulf %383, %384 : vector<8x32xf32>
    %386 = arith.addf %354, %385 : vector<8x32xf32>
    %387 = arith.subf %378, %357 : vector<8x32xf32>
    %388 = arith.mulf %383, %387 : vector<8x32xf32>
    %389 = arith.addf %357, %388 : vector<8x32xf32>
    %390 = arith.mulf %383, %386 : vector<8x32xf32>
    %c11_109 = arith.constant 11 : index
    %c0_110 = arith.constant 0 : index
    %c0_111 = arith.constant 0 : index
    %391 = vector.load %arg7[%c11_109, %c0_110, %c0_111] : memref<18x8x32xf32, #tpu.memory_space<vmem>>, vector<1x8x32xf32>
    %392 = vector.shape_cast %391 : vector<1x8x32xf32> to vector<8x32xf32>
    %393 = vector.shape_cast %390 : vector<8x32xf32> to vector<1x8x32xf32>
    tpu.vector_store %arg7[%c11_109, %c0_110, %c0_111], %393 {strides = array<i32>} : memref<18x8x32xf32, #tpu.memory_space<vmem>>, vector<1x8x32xf32>,
    %394 = arith.truncf %386 : vector<8x32xf32> to vector<8x32xbf16>
    %cst_112 = arith.constant dense<0.000000e+00> : vector<8x128xf32>
    %395 = tpu.matmul %394, %7, %cst_112 {dimension_numbers = #tpu.dot_dimension_numbers<[1], [0], [0], [1], [0, 0, 1, 1], [], []>} : vector<8x32xbf16>, vector<32x128xbf16>, vector<8x128xf32> -> vector<8x128xf32>
    %c96 = arith.constant 96 : index
    %c0_113 = arith.constant 0 : index
    %396 = vector.load %arg9[%c96, %c0_113] : memref<144x128xf32, #tpu.memory_space<vmem>>, vector<8x128xf32>
    %397 = arith.addf %395, %396 : vector<8x128xf32>
    %398 = vector.extract_strided_slice %397 {offsets = [0, 0], sizes = [8, 96], strides = [1, 1]} : vector<8x128xf32> to vector<8x96xf32>
    %399 = arith.negf %398 : vector<8x96xf32>
    %400 = math.exp %399 : vector<8x96xf32>
    %cst_114 = arith.constant 1.000000e+00 : f32
    %401 = vector.broadcast %cst_114 : f32 to vector<8x96xf32>
    %402 = arith.addf %401, %400 : vector<8x96xf32>
    %403 = arith.divf %401, %402 : vector<8x96xf32>
    %404 = vector.extract_strided_slice %397 {offsets = [0, 96], sizes = [8, 32], strides = [1, 1]} : vector<8x128xf32> to vector<8x32xf32>
    %405 = math.tanh %404 : vector<8x32xf32>
    %406 = vector.extract_strided_slice %403 {offsets = [0, 32], sizes = [8, 32], strides = [1, 1]} : vector<8x96xf32> to vector<8x32xf32>
    %407 = arith.mulf %406, %389 : vector<8x32xf32>
    %408 = vector.extract_strided_slice %403 {offsets = [0, 0], sizes = [8, 32], strides = [1, 1]} : vector<8x96xf32> to vector<8x32xf32>
    %409 = arith.mulf %408, %405 : vector<8x32xf32>
    %410 = arith.addf %407, %409 : vector<8x32xf32>
    %411 = vector.extract_strided_slice %403 {offsets = [0, 64], sizes = [8, 32], strides = [1, 1]} : vector<8x96xf32> to vector<8x32xf32>
    %412 = math.tanh %410 : vector<8x32xf32>
    %413 = arith.mulf %411, %412 : vector<8x32xf32>
    %c12 = arith.constant 12 : index
    %c0_115 = arith.constant 0 : index
    %c0_116 = arith.constant 0 : index
    %414 = vector.load %arg1[%c12, %c0_115, %c0_116] : memref<18x8x32xf32, #tpu.memory_space<vmem>>, vector<1x8x32xf32>
    %415 = vector.shape_cast %414 : vector<1x8x32xf32> to vector<8x32xf32>
    %416 = arith.subf %413, %386 : vector<8x32xf32>
    %417 = arith.mulf %415, %416 : vector<8x32xf32>
    %418 = arith.addf %386, %417 : vector<8x32xf32>
    %419 = arith.subf %410, %389 : vector<8x32xf32>
    %420 = arith.mulf %415, %419 : vector<8x32xf32>
    %421 = arith.addf %389, %420 : vector<8x32xf32>
    %422 = arith.mulf %415, %418 : vector<8x32xf32>
    %c12_117 = arith.constant 12 : index
    %c0_118 = arith.constant 0 : index
    %c0_119 = arith.constant 0 : index
    %423 = vector.load %arg7[%c12_117, %c0_118, %c0_119] : memref<18x8x32xf32, #tpu.memory_space<vmem>>, vector<1x8x32xf32>
    %424 = vector.shape_cast %423 : vector<1x8x32xf32> to vector<8x32xf32>
    %425 = vector.shape_cast %422 : vector<8x32xf32> to vector<1x8x32xf32>
    tpu.vector_store %arg7[%c12_117, %c0_118, %c0_119], %425 {strides = array<i32>} : memref<18x8x32xf32, #tpu.memory_space<vmem>>, vector<1x8x32xf32>,
    %426 = arith.truncf %418 : vector<8x32xf32> to vector<8x32xbf16>
    %cst_120 = arith.constant dense<0.000000e+00> : vector<8x128xf32>
    %427 = tpu.matmul %426, %7, %cst_120 {dimension_numbers = #tpu.dot_dimension_numbers<[1], [0], [0], [1], [0, 0, 1, 1], [], []>} : vector<8x32xbf16>, vector<32x128xbf16>, vector<8x128xf32> -> vector<8x128xf32>
    %c104 = arith.constant 104 : index
    %c0_121 = arith.constant 0 : index
    %428 = vector.load %arg9[%c104, %c0_121] : memref<144x128xf32, #tpu.memory_space<vmem>>, vector<8x128xf32>
    %429 = arith.addf %427, %428 : vector<8x128xf32>
    %430 = vector.extract_strided_slice %429 {offsets = [0, 0], sizes = [8, 96], strides = [1, 1]} : vector<8x128xf32> to vector<8x96xf32>
    %431 = arith.negf %430 : vector<8x96xf32>
    %432 = math.exp %431 : vector<8x96xf32>
    %cst_122 = arith.constant 1.000000e+00 : f32
    %433 = vector.broadcast %cst_122 : f32 to vector<8x96xf32>
    %434 = arith.addf %433, %432 : vector<8x96xf32>
    %435 = arith.divf %433, %434 : vector<8x96xf32>
    %436 = vector.extract_strided_slice %429 {offsets = [0, 96], sizes = [8, 32], strides = [1, 1]} : vector<8x128xf32> to vector<8x32xf32>
    %437 = math.tanh %436 : vector<8x32xf32>
    %438 = vector.extract_strided_slice %435 {offsets = [0, 32], sizes = [8, 32], strides = [1, 1]} : vector<8x96xf32> to vector<8x32xf32>
    %439 = arith.mulf %438, %421 : vector<8x32xf32>
    %440 = vector.extract_strided_slice %435 {offsets = [0, 0], sizes = [8, 32], strides = [1, 1]} : vector<8x96xf32> to vector<8x32xf32>
    %441 = arith.mulf %440, %437 : vector<8x32xf32>
    %442 = arith.addf %439, %441 : vector<8x32xf32>
    %443 = vector.extract_strided_slice %435 {offsets = [0, 64], sizes = [8, 32], strides = [1, 1]} : vector<8x96xf32> to vector<8x32xf32>
    %444 = math.tanh %442 : vector<8x32xf32>
    %445 = arith.mulf %443, %444 : vector<8x32xf32>
    %c13 = arith.constant 13 : index
    %c0_123 = arith.constant 0 : index
    %c0_124 = arith.constant 0 : index
    %446 = vector.load %arg1[%c13, %c0_123, %c0_124] : memref<18x8x32xf32, #tpu.memory_space<vmem>>, vector<1x8x32xf32>
    %447 = vector.shape_cast %446 : vector<1x8x32xf32> to vector<8x32xf32>
    %448 = arith.subf %445, %418 : vector<8x32xf32>
    %449 = arith.mulf %447, %448 : vector<8x32xf32>
    %450 = arith.addf %418, %449 : vector<8x32xf32>
    %451 = arith.subf %442, %421 : vector<8x32xf32>
    %452 = arith.mulf %447, %451 : vector<8x32xf32>
    %453 = arith.addf %421, %452 : vector<8x32xf32>
    %454 = arith.mulf %447, %450 : vector<8x32xf32>
    %c13_125 = arith.constant 13 : index
    %c0_126 = arith.constant 0 : index
    %c0_127 = arith.constant 0 : index
    %455 = vector.load %arg7[%c13_125, %c0_126, %c0_127] : memref<18x8x32xf32, #tpu.memory_space<vmem>>, vector<1x8x32xf32>
    %456 = vector.shape_cast %455 : vector<1x8x32xf32> to vector<8x32xf32>
    %457 = vector.shape_cast %454 : vector<8x32xf32> to vector<1x8x32xf32>
    tpu.vector_store %arg7[%c13_125, %c0_126, %c0_127], %457 {strides = array<i32>} : memref<18x8x32xf32, #tpu.memory_space<vmem>>, vector<1x8x32xf32>,
    %458 = arith.truncf %450 : vector<8x32xf32> to vector<8x32xbf16>
    %cst_128 = arith.constant dense<0.000000e+00> : vector<8x128xf32>
    %459 = tpu.matmul %458, %7, %cst_128 {dimension_numbers = #tpu.dot_dimension_numbers<[1], [0], [0], [1], [0, 0, 1, 1], [], []>} : vector<8x32xbf16>, vector<32x128xbf16>, vector<8x128xf32> -> vector<8x128xf32>
    %c112 = arith.constant 112 : index
    %c0_129 = arith.constant 0 : index
    %460 = vector.load %arg9[%c112, %c0_129] : memref<144x128xf32, #tpu.memory_space<vmem>>, vector<8x128xf32>
    %461 = arith.addf %459, %460 : vector<8x128xf32>
    %462 = vector.extract_strided_slice %461 {offsets = [0, 0], sizes = [8, 96], strides = [1, 1]} : vector<8x128xf32> to vector<8x96xf32>
    %463 = arith.negf %462 : vector<8x96xf32>
    %464 = math.exp %463 : vector<8x96xf32>
    %cst_130 = arith.constant 1.000000e+00 : f32
    %465 = vector.broadcast %cst_130 : f32 to vector<8x96xf32>
    %466 = arith.addf %465, %464 : vector<8x96xf32>
    %467 = arith.divf %465, %466 : vector<8x96xf32>
    %468 = vector.extract_strided_slice %461 {offsets = [0, 96], sizes = [8, 32], strides = [1, 1]} : vector<8x128xf32> to vector<8x32xf32>
    %469 = math.tanh %468 : vector<8x32xf32>
    %470 = vector.extract_strided_slice %467 {offsets = [0, 32], sizes = [8, 32], strides = [1, 1]} : vector<8x96xf32> to vector<8x32xf32>
    %471 = arith.mulf %470, %453 : vector<8x32xf32>
    %472 = vector.extract_strided_slice %467 {offsets = [0, 0], sizes = [8, 32], strides = [1, 1]} : vector<8x96xf32> to vector<8x32xf32>
    %473 = arith.mulf %472, %469 : vector<8x32xf32>
    %474 = arith.addf %471, %473 : vector<8x32xf32>
    %475 = vector.extract_strided_slice %467 {offsets = [0, 64], sizes = [8, 32], strides = [1, 1]} : vector<8x96xf32> to vector<8x32xf32>
    %476 = math.tanh %474 : vector<8x32xf32>
    %477 = arith.mulf %475, %476 : vector<8x32xf32>
    %c14 = arith.constant 14 : index
    %c0_131 = arith.constant 0 : index
    %c0_132 = arith.constant 0 : index
    %478 = vector.load %arg1[%c14, %c0_131, %c0_132] : memref<18x8x32xf32, #tpu.memory_space<vmem>>, vector<1x8x32xf32>
    %479 = vector.shape_cast %478 : vector<1x8x32xf32> to vector<8x32xf32>
    %480 = arith.subf %477, %450 : vector<8x32xf32>
    %481 = arith.mulf %479, %480 : vector<8x32xf32>
    %482 = arith.addf %450, %481 : vector<8x32xf32>
    %483 = arith.subf %474, %453 : vector<8x32xf32>
    %484 = arith.mulf %479, %483 : vector<8x32xf32>
    %485 = arith.addf %453, %484 : vector<8x32xf32>
    %486 = arith.mulf %479, %482 : vector<8x32xf32>
    %c14_133 = arith.constant 14 : index
    %c0_134 = arith.constant 0 : index
    %c0_135 = arith.constant 0 : index
    %487 = vector.load %arg7[%c14_133, %c0_134, %c0_135] : memref<18x8x32xf32, #tpu.memory_space<vmem>>, vector<1x8x32xf32>
    %488 = vector.shape_cast %487 : vector<1x8x32xf32> to vector<8x32xf32>
    %489 = vector.shape_cast %486 : vector<8x32xf32> to vector<1x8x32xf32>
    tpu.vector_store %arg7[%c14_133, %c0_134, %c0_135], %489 {strides = array<i32>} : memref<18x8x32xf32, #tpu.memory_space<vmem>>, vector<1x8x32xf32>,
    %490 = arith.truncf %482 : vector<8x32xf32> to vector<8x32xbf16>
    %cst_136 = arith.constant dense<0.000000e+00> : vector<8x128xf32>
    %491 = tpu.matmul %490, %7, %cst_136 {dimension_numbers = #tpu.dot_dimension_numbers<[1], [0], [0], [1], [0, 0, 1, 1], [], []>} : vector<8x32xbf16>, vector<32x128xbf16>, vector<8x128xf32> -> vector<8x128xf32>
    %c120 = arith.constant 120 : index
    %c0_137 = arith.constant 0 : index
    %492 = vector.load %arg9[%c120, %c0_137] : memref<144x128xf32, #tpu.memory_space<vmem>>, vector<8x128xf32>
    %493 = arith.addf %491, %492 : vector<8x128xf32>
    %494 = vector.extract_strided_slice %493 {offsets = [0, 0], sizes = [8, 96], strides = [1, 1]} : vector<8x128xf32> to vector<8x96xf32>
    %495 = arith.negf %494 : vector<8x96xf32>
    %496 = math.exp %495 : vector<8x96xf32>
    %cst_138 = arith.constant 1.000000e+00 : f32
    %497 = vector.broadcast %cst_138 : f32 to vector<8x96xf32>
    %498 = arith.addf %497, %496 : vector<8x96xf32>
    %499 = arith.divf %497, %498 : vector<8x96xf32>
    %500 = vector.extract_strided_slice %493 {offsets = [0, 96], sizes = [8, 32], strides = [1, 1]} : vector<8x128xf32> to vector<8x32xf32>
    %501 = math.tanh %500 : vector<8x32xf32>
    %502 = vector.extract_strided_slice %499 {offsets = [0, 32], sizes = [8, 32], strides = [1, 1]} : vector<8x96xf32> to vector<8x32xf32>
    %503 = arith.mulf %502, %485 : vector<8x32xf32>
    %504 = vector.extract_strided_slice %499 {offsets = [0, 0], sizes = [8, 32], strides = [1, 1]} : vector<8x96xf32> to vector<8x32xf32>
    %505 = arith.mulf %504, %501 : vector<8x32xf32>
    %506 = arith.addf %503, %505 : vector<8x32xf32>
    %507 = vector.extract_strided_slice %499 {offsets = [0, 64], sizes = [8, 32], strides = [1, 1]} : vector<8x96xf32> to vector<8x32xf32>
    %508 = math.tanh %506 : vector<8x32xf32>
    %509 = arith.mulf %507, %508 : vector<8x32xf32>
    %c15 = arith.constant 15 : index
    %c0_139 = arith.constant 0 : index
    %c0_140 = arith.constant 0 : index
    %510 = vector.load %arg1[%c15, %c0_139, %c0_140] : memref<18x8x32xf32, #tpu.memory_space<vmem>>, vector<1x8x32xf32>
    %511 = vector.shape_cast %510 : vector<1x8x32xf32> to vector<8x32xf32>
    %512 = arith.subf %509, %482 : vector<8x32xf32>
    %513 = arith.mulf %511, %512 : vector<8x32xf32>
    %514 = arith.addf %482, %513 : vector<8x32xf32>
    %515 = arith.subf %506, %485 : vector<8x32xf32>
    %516 = arith.mulf %511, %515 : vector<8x32xf32>
    %517 = arith.addf %485, %516 : vector<8x32xf32>
    %518 = arith.mulf %511, %514 : vector<8x32xf32>
    %c15_141 = arith.constant 15 : index
    %c0_142 = arith.constant 0 : index
    %c0_143 = arith.constant 0 : index
    %519 = vector.load %arg7[%c15_141, %c0_142, %c0_143] : memref<18x8x32xf32, #tpu.memory_space<vmem>>, vector<1x8x32xf32>
    %520 = vector.shape_cast %519 : vector<1x8x32xf32> to vector<8x32xf32>
    %521 = vector.shape_cast %518 : vector<8x32xf32> to vector<1x8x32xf32>
    tpu.vector_store %arg7[%c15_141, %c0_142, %c0_143], %521 {strides = array<i32>} : memref<18x8x32xf32, #tpu.memory_space<vmem>>, vector<1x8x32xf32>,
    %522 = arith.truncf %514 : vector<8x32xf32> to vector<8x32xbf16>
    %cst_144 = arith.constant dense<0.000000e+00> : vector<8x128xf32>
    %523 = tpu.matmul %522, %7, %cst_144 {dimension_numbers = #tpu.dot_dimension_numbers<[1], [0], [0], [1], [0, 0, 1, 1], [], []>} : vector<8x32xbf16>, vector<32x128xbf16>, vector<8x128xf32> -> vector<8x128xf32>
    %c128 = arith.constant 128 : index
    %c0_145 = arith.constant 0 : index
    %524 = vector.load %arg9[%c128, %c0_145] : memref<144x128xf32, #tpu.memory_space<vmem>>, vector<8x128xf32>
    %525 = arith.addf %523, %524 : vector<8x128xf32>
    %526 = vector.extract_strided_slice %525 {offsets = [0, 0], sizes = [8, 96], strides = [1, 1]} : vector<8x128xf32> to vector<8x96xf32>
    %527 = arith.negf %526 : vector<8x96xf32>
    %528 = math.exp %527 : vector<8x96xf32>
    %cst_146 = arith.constant 1.000000e+00 : f32
    %529 = vector.broadcast %cst_146 : f32 to vector<8x96xf32>
    %530 = arith.addf %529, %528 : vector<8x96xf32>
    %531 = arith.divf %529, %530 : vector<8x96xf32>
    %532 = vector.extract_strided_slice %525 {offsets = [0, 96], sizes = [8, 32], strides = [1, 1]} : vector<8x128xf32> to vector<8x32xf32>
    %533 = math.tanh %532 : vector<8x32xf32>
    %534 = vector.extract_strided_slice %531 {offsets = [0, 32], sizes = [8, 32], strides = [1, 1]} : vector<8x96xf32> to vector<8x32xf32>
    %535 = arith.mulf %534, %517 : vector<8x32xf32>
    %536 = vector.extract_strided_slice %531 {offsets = [0, 0], sizes = [8, 32], strides = [1, 1]} : vector<8x96xf32> to vector<8x32xf32>
    %537 = arith.mulf %536, %533 : vector<8x32xf32>
    %538 = arith.addf %535, %537 : vector<8x32xf32>
    %539 = vector.extract_strided_slice %531 {offsets = [0, 64], sizes = [8, 32], strides = [1, 1]} : vector<8x96xf32> to vector<8x32xf32>
    %540 = math.tanh %538 : vector<8x32xf32>
    %541 = arith.mulf %539, %540 : vector<8x32xf32>
    %c16_147 = arith.constant 16 : index
    %c0_148 = arith.constant 0 : index
    %c0_149 = arith.constant 0 : index
    %542 = vector.load %arg1[%c16_147, %c0_148, %c0_149] : memref<18x8x32xf32, #tpu.memory_space<vmem>>, vector<1x8x32xf32>
    %543 = vector.shape_cast %542 : vector<1x8x32xf32> to vector<8x32xf32>
    %544 = arith.subf %541, %514 : vector<8x32xf32>
    %545 = arith.mulf %543, %544 : vector<8x32xf32>
    %546 = arith.addf %514, %545 : vector<8x32xf32>
    %547 = arith.subf %538, %517 : vector<8x32xf32>
    %548 = arith.mulf %543, %547 : vector<8x32xf32>
    %549 = arith.addf %517, %548 : vector<8x32xf32>
    %550 = arith.mulf %543, %546 : vector<8x32xf32>
    %c16_150 = arith.constant 16 : index
    %c0_151 = arith.constant 0 : index
    %c0_152 = arith.constant 0 : index
    %551 = vector.load %arg7[%c16_150, %c0_151, %c0_152] : memref<18x8x32xf32, #tpu.memory_space<vmem>>, vector<1x8x32xf32>
    %552 = vector.shape_cast %551 : vector<1x8x32xf32> to vector<8x32xf32>
    %553 = vector.shape_cast %550 : vector<8x32xf32> to vector<1x8x32xf32>
    tpu.vector_store %arg7[%c16_150, %c0_151, %c0_152], %553 {strides = array<i32>} : memref<18x8x32xf32, #tpu.memory_space<vmem>>, vector<1x8x32xf32>,
    %554 = arith.truncf %546 : vector<8x32xf32> to vector<8x32xbf16>
    %cst_153 = arith.constant dense<0.000000e+00> : vector<8x128xf32>
    %555 = tpu.matmul %554, %7, %cst_153 {dimension_numbers = #tpu.dot_dimension_numbers<[1], [0], [0], [1], [0, 0, 1, 1], [], []>} : vector<8x32xbf16>, vector<32x128xbf16>, vector<8x128xf32> -> vector<8x128xf32>
    %c136 = arith.constant 136 : index
    %c0_154 = arith.constant 0 : index
    %556 = vector.load %arg9[%c136, %c0_154] : memref<144x128xf32, #tpu.memory_space<vmem>>, vector<8x128xf32>
    %557 = arith.addf %555, %556 : vector<8x128xf32>
    %558 = vector.extract_strided_slice %557 {offsets = [0, 0], sizes = [8, 96], strides = [1, 1]} : vector<8x128xf32> to vector<8x96xf32>
    %559 = arith.negf %558 : vector<8x96xf32>
    %560 = math.exp %559 : vector<8x96xf32>
    %cst_155 = arith.constant 1.000000e+00 : f32
    %561 = vector.broadcast %cst_155 : f32 to vector<8x96xf32>
    %562 = arith.addf %561, %560 : vector<8x96xf32>
    %563 = arith.divf %561, %562 : vector<8x96xf32>
    %564 = vector.extract_strided_slice %557 {offsets = [0, 96], sizes = [8, 32], strides = [1, 1]} : vector<8x128xf32> to vector<8x32xf32>
    %565 = math.tanh %564 : vector<8x32xf32>
    %566 = vector.extract_strided_slice %563 {offsets = [0, 32], sizes = [8, 32], strides = [1, 1]} : vector<8x96xf32> to vector<8x32xf32>
    %567 = arith.mulf %566, %549 : vector<8x32xf32>
    %568 = vector.extract_strided_slice %563 {offsets = [0, 0], sizes = [8, 32], strides = [1, 1]} : vector<8x96xf32> to vector<8x32xf32>
    %569 = arith.mulf %568, %565 : vector<8x32xf32>
    %570 = arith.addf %567, %569 : vector<8x32xf32>
    %571 = vector.extract_strided_slice %563 {offsets = [0, 64], sizes = [8, 32], strides = [1, 1]} : vector<8x96xf32> to vector<8x32xf32>
    %572 = math.tanh %570 : vector<8x32xf32>
    %573 = arith.mulf %571, %572 : vector<8x32xf32>
    %c17 = arith.constant 17 : index
    %c0_156 = arith.constant 0 : index
    %c0_157 = arith.constant 0 : index
    %574 = vector.load %arg1[%c17, %c0_156, %c0_157] : memref<18x8x32xf32, #tpu.memory_space<vmem>>, vector<1x8x32xf32>
    %575 = vector.shape_cast %574 : vector<1x8x32xf32> to vector<8x32xf32>
    %576 = arith.subf %573, %546 : vector<8x32xf32>
    %577 = arith.mulf %575, %576 : vector<8x32xf32>
    %578 = arith.addf %546, %577 : vector<8x32xf32>
    %579 = arith.mulf %575, %578 : vector<8x32xf32>
    %c17_158 = arith.constant 17 : index
    %c0_159 = arith.constant 0 : index
    %c0_160 = arith.constant 0 : index
    %580 = vector.load %arg7[%c17_158, %c0_159, %c0_160] : memref<18x8x32xf32, #tpu.memory_space<vmem>>, vector<1x8x32xf32>
    %581 = vector.shape_cast %580 : vector<1x8x32xf32> to vector<8x32xf32>
    %582 = vector.shape_cast %579 : vector<8x32xf32> to vector<1x8x32xf32>
    tpu.vector_store %arg7[%c17_158, %c0_159, %c0_160], %582 {strides = array<i32>} : memref<18x8x32xf32, #tpu.memory_space<vmem>>, vector<1x8x32xf32>,
    %c0_161 = arith.constant 0 : index
    %c0_162 = arith.constant 0 : index
    %583 = vector.load %arg8[%c0_161, %c0_162] : memref<8x32xf32, #tpu.memory_space<vmem>>, vector<8x32xf32>
    tpu.vector_store %arg8[%c0_161, %c0_162], %578 {strides = array<i32>} : memref<8x32xf32, #tpu.memory_space<vmem>>, vector<8x32xf32>,
    return
  }
}

</mosaic_0001>

<bundles_post_ra>
// kernel: tpu_custom_call.1
= control target key start
LH: loop header
LB: loop body
LE: loop exit
PB: predicated region body
PF: predicated region fallthrough
CT: control target
= control target key end

     0   :  { %14 = vsyncpa [#allocation4], 0  ;;  %s3168_s0 = inlined_call_operand.vmem [shape: bf16[144,64], index: 0, kind: input, shape index: {}]   ;;  %s3169_s1 = inlined_call_operand.hbm [shape: f32[18,8,32], index: 1, kind: input, shape index: {}]   ;;  %s3170_s2 = inlined_call_operand.vmem [shape: f32[8,32], index: 2, kind: input, shape index: {}]   ;;  %s3171_s3 = inlined_call_operand.vmem [shape: f32[8,32], index: 3, kind: input, shape index: {}]   ;;  %s3172_s4 = inlined_call_operand.vmem [shape: bf16[64,128], index: 4, kind: input, shape index: {}]   ;;  %s3173_s5 = inlined_call_operand.vmem [shape: f32[1,128], index: 5, kind: input, shape index: {}]   ;;  %s3174_s6 = inlined_call_operand.vmem [shape: bf16[32,128], index: 6, kind: input, shape index: {}]   ;;  %s3175_s7 = inlined_call_operand.hbm [shape: f32[18,8,32], index: 7, kind: output, shape index: {0}]   ;;  %s3176_s8 = inlined_call_operand.hbm [shape: f32[8,32], index: 8, kind: output, shape index: {1}]  }
   0x1   :  { %15 = vsyncpa [#allocation5], 0 }
   0x2   :  { %16 = vsyncpa [#allocation8], 0  ;;  %s2628_s27 = smov [#allocation3]   ;;  %s2556_s9 = scalar_lea.hbm %s3169_s1, 2304 }
   0x3   :  { %s24_s28 = sshll.u32 %s2628_s27, 4  ;;  %p2557_p0 = scmp.ne.s32.totalorder %s3169_s1, %s2556_s9  ;;  %s25_s28 = int_to_ptr.vmem [resolvable:$true] %s24_s28 }
   0x4   :  { %p2560_p1 = scmp.lt.u32.totalorder %s2556_s9, %s3169_s1 }
   0x6   :  { %p2562_p2 = pnand %p2560_p1, %p2557_p0 }
   0x8   :  { %2565 = shalt.err (!%p2562_p2)
}
   0x9   :  { %s2566_s14 = scalar_lea.vmem %s25_s28, 2304  ;;  %p2571_p4 = scmp.lt.s32.totalorder %s25_s28, %s25_s28 }
   0xa   :  { %p2567_p3 = scmp.ne.s32.totalorder %s25_s28, %s2566_s14  ;;  %p2572_p5 = scmp.lt.s32.totalorder %s2566_s14, %s2566_s14 }
   0xc   :  { %p2573_p6 = por %p2572_p5, %p2571_p4 }
   0xe   :  { %p2574_p7 = pnand %p2573_p6, %p2567_p3 }
  0x10   :  { %2577 = shalt.err (!%p2574_p7)
}
  0x11   :  { %s2629_s15 = smov 128   ;;  %s2630_s16 = smov 8  }
  0x12   :  { %30 = dma.hbm_to_vmem [thread:$0]  %s3169_s1, 2304, %s25_s28, [#allocation4], %s2629_s15, %s2629_s15, %s2630_s16  }
  0x13   :  { %2622 = dma.done.wait [#allocation4], 2304  }
  0x14   :  { %2623 = vsyncadd [#allocation4], 4294964992  ;;  %v2631_v0 = vmov 0.0   ;;  %vm2632_vm0 = vmmov 0   ;;  %v2394_v1 = vld [vmem:[%s3172_s4] sm:$0xff]   ;;  %v2395_v2 = vld [vmem:[%s3172_s4 + $0x8] sm:$0xff]  }
  0x15   :  { %2196 = vmatprep.subr.bf16.mxu0 %v2631_v0  ;;  %2240 = vmatprep.subr.bf16.mxu1 %v2631_v0  ;;  %v2713_v3 = vld [vmem:[%s3174_s6] sm:$0xff]   ;;  %v2720_v4 = vld [vmem:[%s3174_s6 + $0x8] sm:$0xff]   ;;  %v2397_v5 = vld [vmem:[%s3172_s4 + $0x10] sm:$0xff]   ;;  %vm318_vm1 = vcmask 261120   ;;  %vm147_vm2 = vcmask 523264   ;;  %s2633_s12 = smov 32  }
  0x16   :  { %2244 = vmatprep.mubr.msk.bf16.mxu1 %vm2632_vm0, %v2631_v0  ;;  %2204 = vmatprep.mubr.msk.bf16.mxu0 %vm2632_vm0, %v2631_v0  ;;  %v2729_v6 = vld [vmem:[%s3170_s2] sm:$0xff]  ;;  %v2399_v8 = vld [vmem:[%s3172_s4 + $0x18] sm:$0xff]   ;;  %s2634_s17 = smov 64  }
  0x17   :  { %2197 = vmatpush3.bf16.msra.mxu0 %v2394_v1  ;;  %2241 = vmatpush3.bf16.msra.mxu1 %v2713_v3  ;;  %v304_v7 = vpack.c.bf16 %v2729_v6, %v2729_v6  ;;  %v2400_v9 = vld [vmem:[%s3168_s0] sm:$0xff]  }
  0x18   :  { %2198 = vmatprep.subr.bf16.mxu0 %v2631_v0  ;;  %2242 = vmatprep.subr.bf16.mxu1 %v2631_v0  ;;  %v2761_v14 = vld [vmem:[%s3173_s5] ss:$0 sm:$0xff] }
  0x19   :  { %v303_v22 = vld [vmem:[%s3171_s3] sm:$0xff]  ;;  %s2635_s3 = smov 96  }
  0x1a   :  { %v390_v36 = vld [vmem:[#allocation3] sm:$0xff] }
  0x1b   :  { %2199 = vmatpush3.bf16.msra.mxu0 %v2395_v2  ;;  %2243 = vmatpush3.bf16.msra.mxu1 %v2720_v4 }
  0x1c   :  { %2200 = vmatprep.subr.bf16.mxu0 %v2631_v0  ;;  %2248 = vmatprep.subr.bf16.mxu1 %v2631_v0 }
  0x1e   :  { %2245 = vmatmul.mubr.msk.bf16.vlgmr.msra.gmra.mrb[0].mxu1 %vm318_vm1, %v304_v7  ;;  %v485_v7 = vld [vmem:[#allocation3 + $0x8] sm:$0xff] }
  0x1f   :  { %2201 = vmatpush3.bf16.msra.mxu0 %v2397_v5  ;;  %2249 = vmatpush3.bf16.msra.mxu1 %v2713_v3 }
  0x20   :  { %2202 = vmatprep.subr.bf16.mxu0 %v2631_v0  ;;  %2252 = vmatprep.mubr.msk.bf16.mxu1 %vm2632_vm0, %v2631_v0 }
  0x21   :  { %2250 = vmatprep.subr.bf16.mxu1 %v2631_v0 }
  0x23   :  { %2203 = vmatpush3.bf16.msra.mxu0 %v2399_v8  ;;  %2251 = vmatpush3.bf16.msra.mxu1 %v2720_v4 }
  0x24   :  { %2320 = vmatprep.subr.bf16.mxu0 %v2631_v0  ;;  %2256 = vmatprep.subr.bf16.mxu1 %v2631_v0 }
  0x26   :  { %2205 = vmatmul.mubr.msk.bf16.vlgmr.msra.gmra.mrb[0].mxu0 %vm147_vm2, %v2400_v9  ;;  %v2401_v9 = vld [vmem:[%s3168_s0 + $0x8] sm:$0xff]  }
  0x27   :  { %2208 = vmatprep.mubr.msk.bf16.mxu0 %vm2632_vm0, %v2631_v0  ;;  %2321 = vmatpush3.bf16.msra.mxu0 %v2713_v3 }
  0x28   :  { %2322 = vmatprep.subr.bf16.mxu0 %v2631_v0 }
  0x2b   :  { %2323 = vmatpush3.bf16.msra.mxu0 %v2720_v4 }
  0x2c   :  { %2336 = vmatprep.subr.bf16.mxu0 %v2631_v0 }
  0x2e   :  { %2209 = vmatmul.mubr.msk.bf16.gmra.mrb[4].mxu0 %vm147_vm2, %v2401_v9 }
  0x2f   :  { %2212 = vmatprep.mubr.msk.bf16.mxu0 %vm2632_vm0, %v2631_v0 }
  0xf1   :  { %v356_v10 = vpop.f32.mrb[0].mxu1 }
  0xf2   :  { %v2246_v11 = vpop.f32.mrb[1].mxu1 }
  0xf3   :  { %v359_v12 = vpop.f32.mrb[2].mxu1 }
  0xf4   :  { %v2247_v13 = vpop.f32.mrb[3].mxu1 }
  0xf9   :  { %v209_v15 = vpop.f32.mrb[0].mxu0 }
  0xfa   :  { %v210_v16 = vadd.f32 %v2761_v14, %v209_v15  ;;  %v2206_v17 = vpop.f32.mrb[1].mxu0 }
  0xfb   :  { %v212_v18 = vpop.f32.mrb[2].mxu0 }
  0xfc   :  { %v357_v19 = vadd.f32 %v356_v10, %v210_v16  ;;  %v2207_v20 = vpop.f32.mrb[3].mxu0  ;;  %v213_v48 = vadd.f32 %v2761_v14, %v212_v18 }
  0xfe   :  { %2409 = vtanh.f32 %v357_v19  ;;  %v2094_v23 = vmul.f32 -1.442695, %v357_v19 }
 0x100   :  { %2411 = vpow2.f32 %v2094_v23 }
 0x108   :  { %v2410_v21 = vpop.eup %2409 }
 0x109   :  { %375 = vrot.lane.b32.xlu0 %v2410_v21, %s2633_s12  ;;  %v217_v21 = vpop.f32.mrb[4].mxu0 }
 0x10a   :  { %v2412_v24 = vpop.eup %2411 }
 0x10b   :  { %v365_v25 = vadd.f32 1.0, %v2412_v24 }
 0x10d   :  { %370 = vrot.lane.b32.xlu0 %v303_v22, %s2633_s12  ;;  %2413 = vrcp.f32 %v365_v25  ;;  %v218_v25 = vadd.f32 %v2761_v14, %v217_v21 }
 0x111   :  { %392 = vrot.lane.b32.xlu0 %v2729_v6, %s2634_s17 }
 0x117   :  { %v2414_v26 = vpop.eup %2413 }
 0x17b   :  { %v376_v27 = vpop.permute.xlu0 %375 }
 0x17c   :  { %v378_v28 = vmul.f32 %v2414_v26, %v376_v27 }
 0x17e   :  { %380 = vrot.lane.b32.xlu1 %v378_v28, %s2633_s12 }
 0x17f   :  { %v371_v29 = vpop.permute.xlu0 %370 }
 0x180   :  { %v373_v30 = vmul.f32 %v2414_v26, %v371_v29 }
 0x183   :  { %v393_v35 = vpop.permute.xlu0 %392 }
 0x1f0   :  { %v381_v31 = vpop.permute.xlu1 %380 }
 0x1f1   :  { %v383_v32 = vadd.f32 %v381_v31, %v373_v30 }
 0x1f3   :  { %2415 = vtanh.f32 %v383_v32  ;;  %v402_v33 = vsub.f32 %v383_v32, %v371_v29 }
 0x1f5   :  { %404 = vrot.lane.b32.xlu0 %v402_v33, %s2635_s3 }
 0x1fd   :  { %v2416_v34 = vpop.eup %2415 }
 0x1fe   :  { %386 = vrot.lane.b32.xlu1 %v2416_v34, %s2633_s12 }
 0x267   :  { %v405_v37 = vpop.permute.xlu0 %404 }
 0x268   :  { %v407_v38 = vmul.f32 %v405_v37, %v390_v36 }
 0x26a   :  { %v408_v39 = vadd.f32 %v407_v38, %v303_v22  ;;  %v2210_v22 = vpop.f32.mrb[5].mxu0 }
 0x26b   :  { %v220_v23 = vpop.f32.mrb[6].mxu0 }
 0x26c   :  { %464 = vrot.lane.b32.xlu0 %v408_v39, %s2633_s12  ;;  %v2211_v24 = vpop.f32.mrb[7].mxu0 }
 0x270   :  { %v387_v40 = vpop.permute.xlu1 %386 }
 0x271   :  { %v389_v41 = vmul.f32 %v2414_v26, %v387_v40 }
 0x273   :  { %v395_v42 = vsub.f32 %v389_v41, %v393_v35 }
 0x275   :  { %397 = vrot.lane.b32.xlu1 %v395_v42, %s2634_s17 }
 0x2de   :  { %v465_v61 = vpop.permute.xlu0 %464 }
 0x2e7   :  { %v398_v43 = vpop.permute.xlu1 %397 }
 0x2e8   :  { %v400_v44 = vmul.f32 %v398_v43, %v390_v36 }
 0x2ea   :  { %v401_v45 = vadd.f32 %v400_v44, %v2729_v6 }
 0x2ec   :  { %v409_v46 = vmul.f32 %v401_v45, %v390_v36  ;;  %v411_v47 = vpack.c.bf16 %v401_v45, %v401_v45 }
 0x2ee   :  { %410 = vst.msk [vmem:[#allocation6] sm:$0xff] %vm318_vm1, %v409_v46  ;;  %2253 = vmatmul.mubr.msk.bf16.vlgmr.msra.gmra.mrb[4].mxu1 %vm318_vm1, %v411_v47 }
 0x2ef   :  { %2257 = vmatpush3.bf16.msra.mxu1 %v2713_v3  ;;  %2260 = vmatprep.mubr.msk.bf16.mxu1 %vm2632_vm0, %v2631_v0 }
 0x2f0   :  { %2258 = vmatprep.subr.bf16.mxu1 %v2631_v0 }
 0x2f3   :  { %2259 = vmatpush3.bf16.msra.mxu1 %v2720_v4 }
 0x2f4   :  { %2264 = vmatprep.subr.bf16.mxu1 %v2631_v0 }
 0x3c1   :  { %v450_v49 = vpop.f32.mrb[4].mxu1 }
 0x3c2   :  { %v451_v50 = vadd.f32 %v450_v49, %v213_v48  ;;  %v2254_v51 = vpop.f32.mrb[5].mxu1 }
 0x3c3   :  { %v453_v52 = vpop.f32.mrb[6].mxu1 }
 0x3c4   :  { %2417 = vtanh.f32 %v451_v50  ;;  %v2255_v53 = vpop.f32.mrb[7].mxu1  ;;  %v2096_v55 = vmul.f32 -1.442695, %v451_v50 }
 0x3c6   :  { %2419 = vpow2.f32 %v2096_v55 }
 0x3ce   :  { %v2418_v54 = vpop.eup %2417 }
 0x3cf   :  { %469 = vrot.lane.b32.xlu1 %v2418_v54, %s2633_s12 }
 0x3d0   :  { %v2420_v56 = vpop.eup %2419 }
 0x3d1   :  { %v459_v57 = vadd.f32 1.0, %v2420_v56 }
 0x3d3   :  { %2421 = vrcp.f32 %v459_v57  ;;  %v221_v57 = vadd.f32 %v2761_v14, %v220_v23 }
 0x3dd   :  { %v2422_v58 = vpop.eup %2421 }
 0x3de   :  { %v467_v62 = vmul.f32 %v2422_v58, %v465_v61 }
 0x441   :  { %v470_v59 = vpop.permute.xlu1 %469 }
 0x442   :  { %v472_v60 = vmul.f32 %v2422_v58, %v470_v59 }
 0x444   :  { %474 = vrot.lane.b32.xlu1 %v472_v60, %s2633_s12 }
 0x448   :  { %487 = vrot.lane.b32.xlu1 %v401_v45, %s2634_s17 }
 0x4b6   :  { %v475_v63 = vpop.permute.xlu1 %474 }
 0x4b7   :  { %v477_v1 = vadd.f32 %v475_v63, %v467_v62 }
 0x4b9   :  { %2423 = vtanh.f32 %v477_v1  ;;  %v497_v2 = vsub.f32 %v477_v1, %v465_v61 }
 0x4ba   :  { %v488_v6 = vpop.permute.xlu1 %487 }
 0x4bb   :  { %499 = vrot.lane.b32.xlu1 %v497_v2, %s2635_s3 }
 0x4c3   :  { %v2424_v5 = vpop.eup %2423 }
 0x4c4   :  { %480 = vrot.lane.b32.xlu0 %v2424_v5, %s2633_s12 }
 0x52d   :  { %v500_v8 = vpop.permute.xlu1 %499 }
 0x52e   :  { %v502_v10 = vmul.f32 %v500_v8, %v485_v7 }
 0x530   :  { %v503_v11 = vadd.f32 %v502_v10, %v408_v39 }
 0x532   :  { %560 = vrot.lane.b32.xlu1 %v503_v11, %s2633_s12 }
 0x536   :  { %v481_v12 = vpop.permute.xlu0 %480 }
 0x537   :  { %v483_v13 = vmul.f32 %v2422_v58, %v481_v12 }
 0x539   :  { %v490_v15 = vsub.f32 %v483_v13, %v488_v6 }
 0x53b   :  { %492 = vrot.lane.b32.xlu0 %v490_v15, %s2634_s17 }
 0x5a4   :  { %v561_v38 = vpop.permute.xlu1 %560 }
 0x5ad   :  { %v493_v16 = vpop.permute.xlu0 %492 }
 0x5ae   :  { %v495_v17 = vmul.f32 %v493_v16, %v485_v7 }
 0x5b0   :  { %v496_v18 = vadd.f32 %v495_v17, %v401_v45  ;;  %v581_v45 = vld [vmem:[#allocation3 + $0x10] sm:$0xff]  ;;  %v677_v17 = vld [vmem:[#allocation3 + $0x18] sm:$0xff] }
 0x5b2   :  { %v504_v19 = vmul.f32 %v496_v18, %v485_v7  ;;  %v507_v20 = vpack.c.bf16 %v496_v18, %v496_v18 }
 0x5b4   :  { %506 = vst.msk [vmem:[#allocation6 + $0x8] sm:$0xff] %vm318_vm1, %v504_v19  ;;  %2261 = vmatmul.mubr.msk.bf16.vlgmr.msra.gmra.mrb[8].mxu1 %vm318_vm1, %v507_v20  ;;  %v2402_v19 = vld [vmem:[%s3168_s0 + $0x10] sm:$0xff]  }
 0x5b5   :  { %2265 = vmatpush3.bf16.msra.mxu1 %v2713_v3  ;;  %2268 = vmatprep.mubr.msk.bf16.mxu1 %vm2632_vm0, %v2631_v0 }
 0x5b6   :  { %2266 = vmatprep.subr.bf16.mxu1 %v2631_v0  ;;  %2213 = vmatmul.mubr.msk.bf16.gmra.mrb[8].mxu0 %vm147_vm2, %v2402_v19 }
 0x5b7   :  { %2216 = vmatprep.mubr.msk.bf16.mxu0 %vm2632_vm0, %v2631_v0 }
 0x5b9   :  { %2267 = vmatpush3.bf16.msra.mxu1 %v2720_v4 }
 0x5ba   :  { %2272 = vmatprep.subr.bf16.mxu1 %v2631_v0 }
 0x687   :  { %v546_v26 = vpop.f32.mrb[8].mxu1 }
 0x688   :  { %v547_v27 = vadd.f32 %v546_v26, %v218_v25  ;;  %v2262_v28 = vpop.f32.mrb[9].mxu1 }
 0x689   :  { %v549_v29 = vpop.f32.mrb[10].mxu1 }
 0x68a   :  { %2425 = vtanh.f32 %v547_v27  ;;  %v2263_v30 = vpop.f32.mrb[11].mxu1  ;;  %v2098_v32 = vmul.f32 -1.442695, %v547_v27 }
 0x68b   :  { %v225_v30 = vpop.f32.mrb[8].mxu0 }
 0x68c   :  { %2427 = vpow2.f32 %v2098_v32 }
 0x694   :  { %v2426_v31 = vpop.eup %2425 }
 0x695   :  { %565 = vrot.lane.b32.xlu0 %v2426_v31, %s2633_s12  ;;  %v2214_v31 = vpop.f32.mrb[9].mxu0 }
 0x696   :  { %v2428_v33 = vpop.eup %2427  ;;  %v228_v32 = vpop.f32.mrb[10].mxu0 }
 0x697   :  { %v555_v34 = vadd.f32 1.0, %v2428_v33  ;;  %v2215_v33 = vpop.f32.mrb[11].mxu0 }
 0x699   :  { %2429 = vrcp.f32 %v555_v34  ;;  %v226_v34 = vadd.f32 %v2761_v14, %v225_v30 }
 0x6a3   :  { %v2430_v35 = vpop.eup %2429 }
 0x6a4   :  { %v563_v39 = vmul.f32 %v2430_v35, %v561_v38 }
 0x707   :  { %v566_v36 = vpop.permute.xlu0 %565 }
 0x708   :  { %v568_v37 = vmul.f32 %v2430_v35, %v566_v36 }
 0x70a   :  { %570 = vrot.lane.b32.xlu0 %v568_v37, %s2633_s12 }
 0x70e   :  { %583 = vrot.lane.b32.xlu0 %v496_v18, %s2634_s17 }
 0x77c   :  { %v571_v40 = vpop.permute.xlu0 %570 }
 0x77d   :  { %v573_v41 = vadd.f32 %v571_v40, %v563_v39 }
 0x77f   :  { %2431 = vtanh.f32 %v573_v41  ;;  %v593_v42 = vsub.f32 %v573_v41, %v561_v38 }
 0x780   :  { %v584_v44 = vpop.permute.xlu0 %583 }
 0x781   :  { %595 = vrot.lane.b32.xlu0 %v593_v42, %s2635_s3 }
 0x789   :  { %v2432_v43 = vpop.eup %2431 }
 0x78a   :  { %576 = vrot.lane.b32.xlu1 %v2432_v43, %s2633_s12 }
 0x7f3   :  { %v596_v46 = vpop.permute.xlu0 %595 }
 0x7f4   :  { %v598_v47 = vmul.f32 %v596_v46, %v581_v45 }
 0x7f6   :  { %v599_v48 = vadd.f32 %v598_v47, %v503_v11 }
 0x7f8   :  { %656 = vrot.lane.b32.xlu0 %v599_v48, %s2633_s12 }
 0x7fc   :  { %v577_v49 = vpop.permute.xlu1 %576 }
 0x7fd   :  { %v579_v50 = vmul.f32 %v2430_v35, %v577_v49 }
 0x7ff   :  { %v586_v51 = vsub.f32 %v579_v50, %v584_v44 }
 0x801   :  { %588 = vrot.lane.b32.xlu1 %v586_v51, %s2634_s17 }
 0x86a   :  { %v657_v9 = vpop.permute.xlu0 %656 }
 0x873   :  { %v589_v52 = vpop.permute.xlu1 %588 }
 0x874   :  { %v591_v53 = vmul.f32 %v589_v52, %v581_v45 }
 0x876   :  { %v592_v54 = vadd.f32 %v591_v53, %v496_v18 }
 0x878   :  { %v600_v55 = vmul.f32 %v592_v54, %v581_v45  ;;  %v603_v56 = vpack.c.bf16 %v592_v54, %v592_v54 }
 0x87a   :  { %602 = vst.msk [vmem:[#allocation6 + $0x10] sm:$0xff] %vm318_vm1, %v600_v55  ;;  %2269 = vmatmul.mubr.msk.bf16.vlgmr.msra.gmra.mrb[12].mxu1 %vm318_vm1, %v603_v56 }
 0x87b   :  { %2273 = vmatpush3.bf16.msra.mxu1 %v2713_v3  ;;  %2276 = vmatprep.mubr.msk.bf16.mxu1 %vm2632_vm0, %v2631_v0 }
 0x87c   :  { %2274 = vmatprep.subr.bf16.mxu1 %v2631_v0 }
 0x87f   :  { %2275 = vmatpush3.bf16.msra.mxu1 %v2720_v4 }
 0x880   :  { %2280 = vmatprep.subr.bf16.mxu1 %v2631_v0 }
 0x94d   :  { %v642_v58 = vpop.f32.mrb[12].mxu1 }
 0x94e   :  { %v643_v59 = vadd.f32 %v642_v58, %v221_v57  ;;  %v2270_v60 = vpop.f32.mrb[13].mxu1 }
 0x94f   :  { %v645_v61 = vpop.f32.mrb[14].mxu1 }
 0x950   :  { %2433 = vtanh.f32 %v643_v59  ;;  %v2271_v62 = vpop.f32.mrb[15].mxu1  ;;  %v2100_v1 = vmul.f32 -1.442695, %v643_v59 }
 0x952   :  { %2435 = vpow2.f32 %v2100_v1 }
 0x95a   :  { %v2434_v63 = vpop.eup %2433 }
 0x95b   :  { %661 = vrot.lane.b32.xlu1 %v2434_v63, %s2633_s12 }
 0x95c   :  { %v2436_v2 = vpop.eup %2435 }
 0x95d   :  { %v651_v5 = vadd.f32 1.0, %v2436_v2 }
 0x95f   :  { %2437 = vrcp.f32 %v651_v5  ;;  %v229_v5 = vadd.f32 %v2761_v14, %v228_v32 }
 0x969   :  { %v2438_v6 = vpop.eup %2437 }
 0x96a   :  { %v659_v10 = vmul.f32 %v2438_v6, %v657_v9 }
 0x9cd   :  { %v662_v7 = vpop.permute.xlu1 %661 }
 0x9ce   :  { %v664_v8 = vmul.f32 %v2438_v6, %v662_v7 }
 0x9d0   :  { %666 = vrot.lane.b32.xlu1 %v664_v8, %s2633_s12 }
 0x9d4   :  { %679 = vrot.lane.b32.xlu1 %v592_v54, %s2634_s17 }
 0xa42   :  { %v667_v11 = vpop.permute.xlu1 %666 }
 0xa43   :  { %v669_v12 = vadd.f32 %v667_v11, %v659_v10 }
 0xa45   :  { %2439 = vtanh.f32 %v669_v12  ;;  %v689_v13 = vsub.f32 %v669_v12, %v657_v9 }
 0xa46   :  { %v680_v16 = vpop.permute.xlu1 %679 }
 0xa47   :  { %691 = vrot.lane.b32.xlu1 %v689_v13, %s2635_s3 }
 0xa4f   :  { %v2440_v15 = vpop.eup %2439 }
 0xa50   :  { %672 = vrot.lane.b32.xlu0 %v2440_v15, %s2633_s12 }
 0xab9   :  { %v692_v18 = vpop.permute.xlu1 %691 }
 0xaba   :  { %v694_v20 = vmul.f32 %v692_v18, %v677_v17 }
 0xabc   :  { %v695_v21 = vadd.f32 %v694_v20, %v599_v48 }
 0xabe   :  { %752 = vrot.lane.b32.xlu1 %v695_v21, %s2633_s12 }
 0xac2   :  { %v673_v22 = vpop.permute.xlu0 %672 }
 0xac3   :  { %v675_v23 = vmul.f32 %v2438_v6, %v673_v22 }
 0xac5   :  { %v682_v24 = vsub.f32 %v675_v23, %v680_v16 }
 0xac7   :  { %684 = vrot.lane.b32.xlu0 %v682_v24, %s2634_s17 }
 0xb30   :  { %v753_v47 = vpop.permute.xlu1 %752 }
 0xb39   :  { %v685_v25 = vpop.permute.xlu0 %684 }
 0xb3a   :  { %v687_v26 = vmul.f32 %v685_v25, %v677_v17 }
 0xb3c   :  { %v688_v27 = vadd.f32 %v687_v26, %v592_v54  ;;  %v773_v54 = vld [vmem:[#allocation3 + $0x20] sm:$0xff]  ;;  %v869_v26 = vld [vmem:[#allocation3 + $0x28] sm:$0xff] }
 0xb3e   :  { %v696_v28 = vmul.f32 %v688_v27, %v677_v17  ;;  %v699_v29 = vpack.c.bf16 %v688_v27, %v688_v27 }
 0xb40   :  { %698 = vst.msk [vmem:[#allocation6 + $0x18] sm:$0xff] %vm318_vm1, %v696_v28  ;;  %2277 = vmatmul.mubr.msk.bf16.vlgmr.msra.gmra.mrb[16].mxu1 %vm318_vm1, %v699_v29  ;;  %v2403_v28 = vld [vmem:[%s3168_s0 + $0x18] sm:$0xff]  }
 0xb41   :  { %2281 = vmatpush3.bf16.msra.mxu1 %v2713_v3  ;;  %2284 = vmatprep.mubr.msk.bf16.mxu1 %vm2632_vm0, %v2631_v0 }
 0xb42   :  { %2282 = vmatprep.subr.bf16.mxu1 %v2631_v0  ;;  %2217 = vmatmul.mubr.msk.bf16.gmra.mrb[12].mxu0 %vm147_vm2, %v2403_v28 }
 0xb43   :  { %2220 = vmatprep.mubr.msk.bf16.mxu0 %vm2632_vm0, %v2631_v0 }
 0xb45   :  { %2283 = vmatpush3.bf16.msra.mxu1 %v2720_v4 }
 0xb46   :  { %2288 = vmatprep.subr.bf16.mxu1 %v2631_v0 }
 0xc13   :  { %v738_v35 = vpop.f32.mrb[16].mxu1 }
 0xc14   :  { %v739_v36 = vadd.f32 %v738_v35, %v226_v34  ;;  %v2278_v37 = vpop.f32.mrb[17].mxu1 }
 0xc15   :  { %v741_v38 = vpop.f32.mrb[18].mxu1 }
 0xc16   :  { %2441 = vtanh.f32 %v739_v36  ;;  %v2279_v39 = vpop.f32.mrb[19].mxu1  ;;  %v2102_v41 = vmul.f32 -1.442695, %v739_v36 }
 0xc17   :  { %v233_v39 = vpop.f32.mrb[12].mxu0 }
 0xc18   :  { %2443 = vpow2.f32 %v2102_v41 }
 0xc20   :  { %v2442_v40 = vpop.eup %2441 }
 0xc21   :  { %757 = vrot.lane.b32.xlu0 %v2442_v40, %s2633_s12  ;;  %v2218_v40 = vpop.f32.mrb[13].mxu0 }
 0xc22   :  { %v2444_v42 = vpop.eup %2443  ;;  %v236_v41 = vpop.f32.mrb[14].mxu0 }
 0xc23   :  { %v747_v43 = vadd.f32 1.0, %v2444_v42  ;;  %v2219_v42 = vpop.f32.mrb[15].mxu0 }
 0xc25   :  { %2445 = vrcp.f32 %v747_v43  ;;  %v234_v43 = vadd.f32 %v2761_v14, %v233_v39 }
 0xc2f   :  { %v2446_v44 = vpop.eup %2445 }
 0xc30   :  { %v755_v48 = vmul.f32 %v2446_v44, %v753_v47 }
 0xc93   :  { %v758_v45 = vpop.permute.xlu0 %757 }
 0xc94   :  { %v760_v46 = vmul.f32 %v2446_v44, %v758_v45 }
 0xc96   :  { %762 = vrot.lane.b32.xlu0 %v760_v46, %s2633_s12 }
 0xc9a   :  { %775 = vrot.lane.b32.xlu0 %v688_v27, %s2634_s17 }
 0xd08   :  { %v763_v49 = vpop.permute.xlu0 %762 }
 0xd09   :  { %v765_v50 = vadd.f32 %v763_v49, %v755_v48 }
 0xd0b   :  { %2447 = vtanh.f32 %v765_v50  ;;  %v785_v51 = vsub.f32 %v765_v50, %v753_v47 }
 0xd0c   :  { %v776_v53 = vpop.permute.xlu0 %775 }
 0xd0d   :  { %787 = vrot.lane.b32.xlu0 %v785_v51, %s2635_s3 }
 0xd15   :  { %v2448_v52 = vpop.eup %2447 }
 0xd16   :  { %768 = vrot.lane.b32.xlu1 %v2448_v52, %s2633_s12 }
 0xd7f   :  { %v788_v55 = vpop.permute.xlu0 %787 }
 0xd80   :  { %v790_v56 = vmul.f32 %v788_v55, %v773_v54 }
 0xd82   :  { %v791_v57 = vadd.f32 %v790_v56, %v695_v21 }
 0xd84   :  { %848 = vrot.lane.b32.xlu0 %v791_v57, %s2633_s12 }
 0xd88   :  { %v769_v58 = vpop.permute.xlu1 %768 }
 0xd89   :  { %v771_v59 = vmul.f32 %v2446_v44, %v769_v58 }
 0xd8b   :  { %v778_v60 = vsub.f32 %v771_v59, %v776_v53 }
 0xd8d   :  { %780 = vrot.lane.b32.xlu1 %v778_v60, %s2634_s17 }
 0xdf6   :  { %v849_v19 = vpop.permute.xlu0 %848 }
 0xdff   :  { %v781_v61 = vpop.permute.xlu1 %780 }
 0xe00   :  { %v783_v62 = vmul.f32 %v781_v61, %v773_v54 }
 0xe02   :  { %v784_v63 = vadd.f32 %v783_v62, %v688_v27 }
 0xe04   :  { %v792_v1 = vmul.f32 %v784_v63, %v773_v54  ;;  %v795_v2 = vpack.c.bf16 %v784_v63, %v784_v63 }
 0xe06   :  { %794 = vst.msk [vmem:[#allocation6 + $0x20] sm:$0xff] %vm318_vm1, %v792_v1  ;;  %2285 = vmatmul.mubr.msk.bf16.vlgmr.msra.gmra.mrb[20].mxu1 %vm318_vm1, %v795_v2 }
 0xe07   :  { %2289 = vmatpush3.bf16.msra.mxu1 %v2713_v3  ;;  %2292 = vmatprep.mubr.msk.bf16.mxu1 %vm2632_vm0, %v2631_v0 }
 0xe08   :  { %2290 = vmatprep.subr.bf16.mxu1 %v2631_v0 }
 0xe0b   :  { %2291 = vmatpush3.bf16.msra.mxu1 %v2720_v4 }
 0xe0c   :  { %2296 = vmatprep.subr.bf16.mxu1 %v2631_v0 }
 0xed9   :  { %v834_v6 = vpop.f32.mrb[20].mxu1 }
 0xeda   :  { %v835_v7 = vadd.f32 %v834_v6, %v229_v5  ;;  %v2286_v8 = vpop.f32.mrb[21].mxu1 }
 0xedb   :  { %v837_v9 = vpop.f32.mrb[22].mxu1 }
 0xedc   :  { %2449 = vtanh.f32 %v835_v7  ;;  %v2287_v10 = vpop.f32.mrb[23].mxu1  ;;  %v2104_v12 = vmul.f32 -1.442695, %v835_v7 }
 0xede   :  { %2451 = vpow2.f32 %v2104_v12 }
 0xee6   :  { %v2450_v11 = vpop.eup %2449 }
 0xee7   :  { %853 = vrot.lane.b32.xlu1 %v2450_v11, %s2633_s12 }
 0xee8   :  { %v2452_v13 = vpop.eup %2451 }
 0xee9   :  { %v843_v15 = vadd.f32 1.0, %v2452_v13 }
 0xeeb   :  { %2453 = vrcp.f32 %v843_v15  ;;  %v237_v15 = vadd.f32 %v2761_v14, %v236_v41 }
 0xef5   :  { %v2454_v16 = vpop.eup %2453 }
 0xef6   :  { %v851_v20 = vmul.f32 %v2454_v16, %v849_v19 }
 0xf59   :  { %v854_v17 = vpop.permute.xlu1 %853 }
 0xf5a   :  { %v856_v18 = vmul.f32 %v2454_v16, %v854_v17 }
 0xf5c   :  { %858 = vrot.lane.b32.xlu1 %v856_v18, %s2633_s12 }
 0xf60   :  { %871 = vrot.lane.b32.xlu1 %v784_v63, %s2634_s17 }
 0xfce   :  { %v859_v21 = vpop.permute.xlu1 %858 }
 0xfcf   :  { %v861_v22 = vadd.f32 %v859_v21, %v851_v20 }
 0xfd1   :  { %2455 = vtanh.f32 %v861_v22  ;;  %v881_v23 = vsub.f32 %v861_v22, %v849_v19 }
 0xfd2   :  { %v872_v25 = vpop.permute.xlu1 %871 }
 0xfd3   :  { %883 = vrot.lane.b32.xlu1 %v881_v23, %s2635_s3 }
 0xfdb   :  { %v2456_v24 = vpop.eup %2455 }
 0xfdc   :  { %864 = vrot.lane.b32.xlu0 %v2456_v24, %s2633_s12 }
0x1045   :  { %v884_v27 = vpop.permute.xlu1 %883 }
0x1046   :  { %v886_v29 = vmul.f32 %v884_v27, %v869_v26 }
0x1048   :  { %v887_v30 = vadd.f32 %v886_v29, %v791_v57 }
0x104a   :  { %944 = vrot.lane.b32.xlu1 %v887_v30, %s2633_s12 }
0x104e   :  { %v865_v31 = vpop.permute.xlu0 %864 }
0x104f   :  { %v867_v32 = vmul.f32 %v2454_v16, %v865_v31 }
0x1051   :  { %v874_v33 = vsub.f32 %v867_v32, %v872_v25 }
0x1053   :  { %876 = vrot.lane.b32.xlu0 %v874_v33, %s2634_s17 }
0x10bc   :  { %v945_v56 = vpop.permute.xlu1 %944 }
0x10c5   :  { %v877_v34 = vpop.permute.xlu0 %876 }
0x10c6   :  { %v879_v35 = vmul.f32 %v877_v34, %v869_v26 }
0x10c8   :  { %v880_v36 = vadd.f32 %v879_v35, %v784_v63  ;;  %v965_v63 = vld [vmem:[#allocation3 + $0x30] sm:$0xff]  ;;  %v1061_v35 = vld [vmem:[#allocation3 + $0x38] sm:$0xff] }
0x10ca   :  { %v888_v37 = vmul.f32 %v880_v36, %v869_v26  ;;  %v891_v38 = vpack.c.bf16 %v880_v36, %v880_v36 }
0x10cc   :  { %890 = vst.msk [vmem:[#allocation6 + $0x28] sm:$0xff] %vm318_vm1, %v888_v37  ;;  %2293 = vmatmul.mubr.msk.bf16.vlgmr.msra.gmra.mrb[24].mxu1 %vm318_vm1, %v891_v38  ;;  %v2404_v37 = vld [vmem:[%s3168_s0 + $0x20] sm:$0xff]  }
0x10cd   :  { %2297 = vmatpush3.bf16.msra.mxu1 %v2713_v3  ;;  %2300 = vmatprep.mubr.msk.bf16.mxu1 %vm2632_vm0, %v2631_v0 }
0x10ce   :  { %2298 = vmatprep.subr.bf16.mxu1 %v2631_v0  ;;  %2221 = vmatmul.mubr.msk.bf16.gmra.mrb[16].mxu0 %vm147_vm2, %v2404_v37 }
0x10cf   :  { %2224 = vmatprep.mubr.msk.bf16.mxu0 %vm2632_vm0, %v2631_v0 }
0x10d1   :  { %2299 = vmatpush3.bf16.msra.mxu1 %v2720_v4 }
0x10d2   :  { %2304 = vmatprep.subr.bf16.mxu1 %v2631_v0 }
0x119f   :  { %v930_v44 = vpop.f32.mrb[24].mxu1 }
0x11a0   :  { %v931_v45 = vadd.f32 %v930_v44, %v234_v43  ;;  %v2294_v46 = vpop.f32.mrb[25].mxu1 }
0x11a1   :  { %v933_v47 = vpop.f32.mrb[26].mxu1 }
0x11a2   :  { %2457 = vtanh.f32 %v931_v45  ;;  %v2295_v48 = vpop.f32.mrb[27].mxu1  ;;  %v2106_v50 = vmul.f32 -1.442695, %v931_v45 }
0x11a3   :  { %v241_v48 = vpop.f32.mrb[16].mxu0 }
0x11a4   :  { %2459 = vpow2.f32 %v2106_v50 }
0x11ac   :  { %v2458_v49 = vpop.eup %2457 }
0x11ad   :  { %949 = vrot.lane.b32.xlu0 %v2458_v49, %s2633_s12  ;;  %v2222_v49 = vpop.f32.mrb[17].mxu0 }
0x11ae   :  { %v2460_v51 = vpop.eup %2459  ;;  %v244_v50 = vpop.f32.mrb[18].mxu0 }
0x11af   :  { %v939_v52 = vadd.f32 1.0, %v2460_v51  ;;  %v2223_v51 = vpop.f32.mrb[19].mxu0 }
0x11b1   :  { %2461 = vrcp.f32 %v939_v52  ;;  %v242_v52 = vadd.f32 %v2761_v14, %v241_v48 }
0x11bb   :  { %v2462_v53 = vpop.eup %2461 }
0x11bc   :  { %v947_v57 = vmul.f32 %v2462_v53, %v945_v56 }
0x121f   :  { %v950_v54 = vpop.permute.xlu0 %949 }
0x1220   :  { %v952_v55 = vmul.f32 %v2462_v53, %v950_v54 }
0x1222   :  { %954 = vrot.lane.b32.xlu0 %v952_v55, %s2633_s12 }
0x1226   :  { %967 = vrot.lane.b32.xlu0 %v880_v36, %s2634_s17 }
0x1294   :  { %v955_v58 = vpop.permute.xlu0 %954 }
0x1295   :  { %v957_v59 = vadd.f32 %v955_v58, %v947_v57 }
0x1297   :  { %2463 = vtanh.f32 %v957_v59  ;;  %v977_v60 = vsub.f32 %v957_v59, %v945_v56 }
0x1298   :  { %v968_v62 = vpop.permute.xlu0 %967 }
0x1299   :  { %979 = vrot.lane.b32.xlu0 %v977_v60, %s2635_s3 }
0x12a1   :  { %v2464_v61 = vpop.eup %2463 }
0x12a2   :  { %960 = vrot.lane.b32.xlu1 %v2464_v61, %s2633_s12 }
0x130b   :  { %v980_v1 = vpop.permute.xlu0 %979 }
0x130c   :  { %v982_v2 = vmul.f32 %v980_v1, %v965_v63 }
0x130e   :  { %v983_v5 = vadd.f32 %v982_v2, %v887_v30 }
0x1310   :  { %1040 = vrot.lane.b32.xlu0 %v983_v5, %s2633_s12 }
0x1314   :  { %v961_v6 = vpop.permute.xlu1 %960 }
0x1315   :  { %v963_v7 = vmul.f32 %v2462_v53, %v961_v6 }
0x1317   :  { %v970_v8 = vsub.f32 %v963_v7, %v968_v62 }
0x1319   :  { %972 = vrot.lane.b32.xlu1 %v970_v8, %s2634_s17 }
0x1382   :  { %v1041_v28 = vpop.permute.xlu0 %1040 }
0x138b   :  { %v973_v9 = vpop.permute.xlu1 %972 }
0x138c   :  { %v975_v10 = vmul.f32 %v973_v9, %v965_v63  ;;  %v1157_v9 = vld [vmem:[#allocation3 + $0x40] sm:$0xff] }
0x138e   :  { %v976_v11 = vadd.f32 %v975_v10, %v880_v36 }
0x1390   :  { %v984_v12 = vmul.f32 %v976_v11, %v965_v63  ;;  %v987_v13 = vpack.c.bf16 %v976_v11, %v976_v11 }
0x1392   :  { %986 = vst.msk [vmem:[#allocation6 + $0x30] sm:$0xff] %vm318_vm1, %v984_v12  ;;  %2301 = vmatmul.mubr.msk.bf16.vlgmr.msra.gmra.mrb[28].mxu1 %vm318_vm1, %v987_v13 }
0x1393   :  { %2305 = vmatpush3.bf16.msra.mxu1 %v2713_v3  ;;  %2308 = vmatprep.mubr.msk.bf16.mxu1 %vm2632_vm0, %v2631_v0 }
0x1394   :  { %2306 = vmatprep.subr.bf16.mxu1 %v2631_v0 }
0x1397   :  { %2307 = vmatpush3.bf16.msra.mxu1 %v2720_v4 }
0x1398   :  { %2312 = vmatprep.subr.bf16.mxu1 %v2631_v0 }
0x1465   :  { %v1026_v16 = vpop.f32.mrb[28].mxu1 }
0x1466   :  { %v1027_v17 = vadd.f32 %v1026_v16, %v237_v15  ;;  %v2302_v18 = vpop.f32.mrb[29].mxu1 }
0x1467   :  { %v1029_v19 = vpop.f32.mrb[30].mxu1 }
0x1468   :  { %2465 = vtanh.f32 %v1027_v17  ;;  %v2303_v20 = vpop.f32.mrb[31].mxu1  ;;  %v2108_v22 = vmul.f32 -1.442695, %v1027_v17 }
0x146a   :  { %2467 = vpow2.f32 %v2108_v22  ;;  %v2942_v22 = vld [vmem:[%s3174_s6] sm:$0xff]  }
0x1472   :  { %v2466_v21 = vpop.eup %2465 }
0x1473   :  { %1045 = vrot.lane.b32.xlu1 %v2466_v21, %s2633_s12 }
0x1474   :  { %v2468_v23 = vpop.eup %2467 }
0x1475   :  { %v1035_v24 = vadd.f32 1.0, %v2468_v23  ;;  %v2951_v23 = vld [vmem:[%s3174_s6 + $0x8] sm:$0xff]  }
0x1477   :  { %2469 = vrcp.f32 %v1035_v24  ;;  %v245_v24 = vadd.f32 %v2761_v14, %v244_v50 }
0x1481   :  { %v2470_v25 = vpop.eup %2469 }
0x1482   :  { %v1043_v29 = vmul.f32 %v2470_v25, %v1041_v28 }
0x14e5   :  { %v1046_v26 = vpop.permute.xlu1 %1045 }
0x14e6   :  { %v1048_v27 = vmul.f32 %v2470_v25, %v1046_v26 }
0x14e8   :  { %1050 = vrot.lane.b32.xlu1 %v1048_v27, %s2633_s12 }
0x14ec   :  { %1063 = vrot.lane.b32.xlu1 %v976_v11, %s2634_s17 }
0x155a   :  { %v1051_v30 = vpop.permute.xlu1 %1050 }
0x155b   :  { %v1053_v31 = vadd.f32 %v1051_v30, %v1043_v29 }
0x155d   :  { %2471 = vtanh.f32 %v1053_v31  ;;  %v1073_v32 = vsub.f32 %v1053_v31, %v1041_v28 }
0x155e   :  { %v1064_v34 = vpop.permute.xlu1 %1063 }
0x155f   :  { %1075 = vrot.lane.b32.xlu1 %v1073_v32, %s2635_s3 }
0x1567   :  { %v2472_v33 = vpop.eup %2471 }
0x1568   :  { %1056 = vrot.lane.b32.xlu0 %v2472_v33, %s2633_s12 }
0x15d1   :  { %v1076_v36 = vpop.permute.xlu1 %1075 }
0x15d2   :  { %v1078_v38 = vmul.f32 %v1076_v36, %v1061_v35 }
0x15d4   :  { %v1079_v39 = vadd.f32 %v1078_v38, %v983_v5 }
0x15d6   :  { %1136 = vrot.lane.b32.xlu1 %v1079_v39, %s2633_s12 }
0x15da   :  { %v1057_v40 = vpop.permute.xlu0 %1056 }
0x15db   :  { %v1059_v41 = vmul.f32 %v2470_v25, %v1057_v40 }
0x15dd   :  { %v1066_v42 = vsub.f32 %v1059_v41, %v1064_v34  ;;  %v2405_v41 = vld [vmem:[%s3168_s0 + $0x28] sm:$0xff]  }
0x15de   :  { %2225 = vmatmul.mubr.msk.bf16.gmra.mrb[20].mxu0 %vm147_vm2, %v2405_v41 }
0x15df   :  { %1068 = vrot.lane.b32.xlu0 %v1066_v42, %s2634_s17  ;;  %2228 = vmatprep.mubr.msk.bf16.mxu0 %vm2632_vm0, %v2631_v0  ;;  %v2406_v42 = vld [vmem:[%s3168_s0 + $0x30] sm:$0xff]  }
0x15e6   :  { %2229 = vmatmul.mubr.msk.bf16.gmra.mrb[24].mxu0 %vm147_vm2, %v2406_v42 }
0x15e7   :  { %2232 = vmatprep.mubr.msk.bf16.mxu0 %vm2632_vm0, %v2631_v0 }
0x1648   :  { %v1137_v63 = vpop.permute.xlu1 %1136 }
0x1651   :  { %v1069_v43 = vpop.permute.xlu0 %1068 }
0x1652   :  { %v1071_v44 = vmul.f32 %v1069_v43, %v1061_v35 }
0x1654   :  { %v1072_v45 = vadd.f32 %v1071_v44, %v976_v11  ;;  %v2407_v44 = vld [vmem:[%s3168_s0 + $0x38] sm:$0xff]  }
0x1655   :  { %2233 = vmatmul.mubr.msk.bf16.gmra.mrb[28].mxu0 %vm147_vm2, %v2407_v44 }
0x1656   :  { %v1080_v46 = vmul.f32 %v1072_v45, %v1061_v35  ;;  %v1083_v47 = vpack.c.bf16 %v1072_v45, %v1072_v45  ;;  %2236 = vmatprep.mubr.msk.bf16.mxu0 %vm2632_vm0, %v2631_v0 }
0x1658   :  { %1082 = vst.msk [vmem:[#allocation6 + $0x38] sm:$0xff] %vm318_vm1, %v1080_v46  ;;  %2309 = vmatmul.mubr.msk.bf16.vlgmr.msra.gmra.mrb[32].mxu1 %vm318_vm1, %v1083_v47  ;;  %v1253_v47 = vld [vmem:[#allocation3 + $0x48] sm:$0xff] }
0x1659   :  { %2313 = vmatpush3.bf16.msra.mxu1 %v2713_v3  ;;  %2316 = vmatprep.mubr.msk.bf16.mxu1 %vm2632_vm0, %v2631_v0 }
0x165a   :  { %2314 = vmatprep.subr.bf16.mxu1 %v2631_v0 }
0x165d   :  { %2315 = vmatpush3.bf16.msra.mxu1 %v2720_v4 }
0x165e   :  { %2328 = vmatprep.subr.bf16.mxu1 %v2631_v0 }
0x172b   :  { %v1122_v53 = vpop.f32.mrb[32].mxu1 }
0x172c   :  { %v1123_v54 = vadd.f32 %v1122_v53, %v242_v52  ;;  %v2310_v55 = vpop.f32.mrb[33].mxu1 }
0x172d   :  { %v1125_v56 = vpop.f32.mrb[34].mxu1 }
0x172e   :  { %2473 = vtanh.f32 %v1123_v54  ;;  %v2311_v3 = vpop.f32.mrb[35].mxu1  ;;  %v2110_v58 = vmul.f32 -1.442695, %v1123_v54  ;;  %v249_v54 = vpop.f32.mrb[20].mxu0 }
0x172f   :  { %v2226_v55 = vpop.f32.mrb[21].mxu0 }
0x1730   :  { %2475 = vpow2.f32 %v2110_v58  ;;  %v2992_v56 = vpop.f32.mrb[22].mxu0 }
0x1731   :  { %v2227_v3 = vpop.f32.mrb[23].mxu0 }
0x1738   :  { %v2474_v57 = vpop.eup %2473 }
0x1739   :  { %1141 = vrot.lane.b32.xlu0 %v2474_v57, %s2633_s12  ;;  %v2994_v57 = vpop.f32.mrb[24].mxu0 }
0x173a   :  { %v2476_v4 = vpop.eup %2475  ;;  %v2230_v58 = vpop.f32.mrb[25].mxu0 }
0x173b   :  { %v1131_v59 = vadd.f32 1.0, %v2476_v4  ;;  %v2996_v4 = vpop.f32.mrb[26].mxu0 }
0x173d   :  { %2477 = vrcp.f32 %v1131_v59  ;;  %v2231_v59 = vpop.f32.mrb[27].mxu0 }
0x1747   :  { %v2478_v60 = vpop.eup %2477 }
0x1748   :  { %v1139_v1 = vmul.f32 %v2478_v60, %v1137_v63 }
0x17ab   :  { %v1142_v61 = vpop.permute.xlu0 %1141 }
0x17ac   :  { %v1144_v62 = vmul.f32 %v2478_v60, %v1142_v61 }
0x17ae   :  { %1146 = vrot.lane.b32.xlu0 %v1144_v62, %s2633_s12 }
0x17b2   :  { %1159 = vrot.lane.b32.xlu0 %v1072_v45, %s2634_s17 }
0x1820   :  { %v1147_v2 = vpop.permute.xlu0 %1146 }
0x1821   :  { %v1149_v5 = vadd.f32 %v1147_v2, %v1139_v1 }
0x1823   :  { %2479 = vtanh.f32 %v1149_v5  ;;  %v1169_v6 = vsub.f32 %v1149_v5, %v1137_v63 }
0x1824   :  { %v1160_v8 = vpop.permute.xlu0 %1159 }
0x1825   :  { %1171 = vrot.lane.b32.xlu0 %v1169_v6, %s2635_s3 }
0x182d   :  { %v2480_v7 = vpop.eup %2479 }
0x182e   :  { %1152 = vrot.lane.b32.xlu1 %v2480_v7, %s2633_s12 }
0x1897   :  { %v1172_v10 = vpop.permute.xlu0 %1171 }
0x1898   :  { %v1174_v11 = vmul.f32 %v1172_v10, %v1157_v9 }
0x189a   :  { %v2927_v12 = vadd.f32 %v1174_v11, %v1079_v39 }
0x189c   :  { %1232 = vrot.lane.b32.xlu0 %v2927_v12, %s2633_s12 }
0x18a0   :  { %v1153_v13 = vpop.permute.xlu1 %1152 }
0x18a1   :  { %v1155_v15 = vmul.f32 %v2478_v60, %v1153_v13  ;;  %v2998_v60 = vpop.f32.mrb[28].mxu0 }
0x18a2   :  { %v2234_v61 = vpop.f32.mrb[29].mxu0 }
0x18a3   :  { %v1162_v16 = vsub.f32 %v1155_v15, %v1160_v8  ;;  %v3000_v62 = vpop.f32.mrb[30].mxu0 }
0x18a4   :  { %v2235_v63 = vpop.f32.mrb[31].mxu0 }
0x18a5   :  { %1164 = vrot.lane.b32.xlu1 %v1162_v16, %s2634_s17 }
0x190e   :  { %v1233_v14 = vpop.permute.xlu0 %1232 }
0x1917   :  { %v1165_v17 = vpop.permute.xlu1 %1164 }
0x1918   :  { %v1167_v18 = vmul.f32 %v1165_v17, %v1157_v9 }
0x191a   :  { %v2932_v19 = vadd.f32 %v1167_v18, %v1072_v45  ;;  %v2408_v45 = vld [vmem:[%s3168_s0 + $0x40] sm:$0xff]  }
0x191b   :  { %2237 = vmatmul.mubr.msk.bf16.gmra.mrb[32].mxu0 %vm147_vm2, %v2408_v45 }
0x191c   :  { %v1176_v20 = vmul.f32 %v2932_v19, %v1157_v9  ;;  %v1179_v21 = vpack.c.bf16 %v2932_v19, %v2932_v19  ;;  %2324 = vmatprep.mubr.msk.bf16.mxu0 %vm2632_vm0, %v2631_v0 }
0x191e   :  { %1178 = vst.msk [vmem:[#allocation6 + $0x40] sm:$0xff] %vm318_vm1, %v1176_v20  ;;  %2317 = vmatmul.mubr.msk.bf16.vlgmr.msra.gmra.mrb[36].mxu1 %vm318_vm1, %v1179_v21 }
0x191f   :  { %2329 = vmatpush3.bf16.msra.mxu1 %v2942_v22  ;;  %2332 = vmatprep.mubr.msk.bf16.mxu1 %vm2632_vm0, %v2631_v0 }
0x1920   :  { %2330 = vmatprep.subr.bf16.mxu1 %v2631_v0 }
0x1923   :  { %2331 = vmatpush3.bf16.msra.mxu1 %v2951_v23 }
0x1924   :  { %2344 = vmatprep.subr.bf16.mxu1 %v2631_v0 }
0x19ee   :  { %v3011_v8 = vpop.f32.mrb[32].mxu0 }
0x19ef   :  { %v2238_v9 = vpop.f32.mrb[33].mxu0 }
0x19f0   :  { %v3013_v10 = vpop.f32.mrb[34].mxu0  ;;  %v1445_v9 = vld [vmem:[#allocation3 + $0x58] sm:$0xff] }
0x19f1   :  { %v1218_v25 = vpop.f32.mrb[36].mxu1  ;;  %v2239_v11 = vpop.f32.mrb[35].mxu0 }
0x19f2   :  { %v1219_v26 = vadd.f32 %v1218_v25, %v245_v24  ;;  %v2318_v27 = vpop.f32.mrb[37].mxu1 }
0x19f3   :  { %v1221_v28 = vpop.f32.mrb[38].mxu1 }
0x19f4   :  { %2481 = vtanh.f32 %v1219_v26  ;;  %v2319_v29 = vpop.f32.mrb[39].mxu1  ;;  %v2112_v31 = vmul.f32 -1.442695, %v1219_v26 }
0x19f6   :  { %2483 = vpow2.f32 %v2112_v31 }
0x19fe   :  { %v2482_v30 = vpop.eup %2481 }
0x19ff   :  { %1237 = vrot.lane.b32.xlu1 %v2482_v30, %s2633_s12 }
0x1a00   :  { %v2484_v32 = vpop.eup %2483 }
0x1a01   :  { %v1227_v33 = vadd.f32 1.0, %v2484_v32 }
0x1a03   :  { %2485 = vrcp.f32 %v1227_v33 }
0x1a0d   :  { %v2486_v34 = vpop.eup %2485 }
0x1a0e   :  { %v1235_v37 = vmul.f32 %v2486_v34, %v1233_v14 }
0x1a71   :  { %v1238_v35 = vpop.permute.xlu1 %1237 }
0x1a72   :  { %v1240_v36 = vmul.f32 %v2486_v34, %v1238_v35 }
0x1a74   :  { %1242 = vrot.lane.b32.xlu1 %v1240_v36, %s2633_s12  ;;  %v1349_v36 = vld [vmem:[#allocation3 + $0x50] sm:$0xff] }
0x1a78   :  { %1255 = vrot.lane.b32.xlu1 %v2932_v19, %s2634_s17 }
0x1ae6   :  { %v1243_v38 = vpop.permute.xlu1 %1242 }
0x1ae7   :  { %v1245_v39 = vadd.f32 %v1243_v38, %v1235_v37 }
0x1ae9   :  { %2487 = vtanh.f32 %v1245_v39  ;;  %v1265_v40 = vsub.f32 %v1245_v39, %v1233_v14 }
0x1aea   :  { %v1256_v46 = vpop.permute.xlu1 %1255 }
0x1aeb   :  { %1267 = vrot.lane.b32.xlu1 %v1265_v40, %s2635_s3 }
0x1af3   :  { %v2488_v43 = vpop.eup %2487 }
0x1af4   :  { %1248 = vrot.lane.b32.xlu0 %v2488_v43, %s2633_s12 }
0x1b5d   :  { %v1268_v48 = vpop.permute.xlu1 %1267 }
0x1b5e   :  { %v1270_v49 = vmul.f32 %v1268_v48, %v1253_v47 }
0x1b60   :  { %v2987_v50 = vadd.f32 %v1270_v49, %v2927_v12  ;;  %v3018_v12 = vld [vmem:[%s3173_s5] ss:$0 sm:$0xff]  ;;  %s2636_s5 = smov [#allocation7]  }
0x1b61   :  { %v250_v13 = vadd.f32 %v3018_v12, %v249_v54  ;;  %s2055_s14 = sshll.u32 %s2636_s5, 4  ;;  %s2056_s14 = int_to_ptr.vmem [resolvable:$true] %s2055_s14 }
0x1b62   :  { %1328 = vrot.lane.b32.xlu1 %v2987_v50, %s2633_s12  ;;  %p2583_p9 = scmp.lt.s32.totalorder %s2056_s14, %s2056_s14 }
0x1b66   :  { %v1249_v51 = vpop.permute.xlu0 %1248 }
0x1b67   :  { %v1251_v52 = vmul.f32 %v2486_v34, %v1249_v51 }
0x1b69   :  { %v1258_v53 = vsub.f32 %v1251_v52, %v1256_v46 }
0x1b6b   :  { %1260 = vrot.lane.b32.xlu0 %v1258_v53, %s2634_s17 }
0x1bd4   :  { %v1329_v29 = vpop.permute.xlu1 %1328 }
0x1bdd   :  { %v1261_v1 = vpop.permute.xlu0 %1260 }
0x1bde   :  { %v1263_v2 = vmul.f32 %v1261_v1, %v1253_v47 }
0x1be0   :  { %v1264_v5 = vadd.f32 %v1263_v2, %v2932_v19 }
0x1be2   :  { %v1272_v6 = vmul.f32 %v1264_v5, %v1253_v47  ;;  %v1275_v7 = vpack.c.bf16 %v1264_v5, %v1264_v5  ;;  %v253_v47 = vadd.f32 %v3018_v12, %v2992_v56 }
0x1be4   :  { %1274 = vst.msk [vmem:[#allocation6 + $0x48] sm:$0xff] %vm318_vm1, %v1272_v6  ;;  %2325 = vmatmul.mubr.msk.bf16.vlgmr.msra.gmra.mrb[36].mxu0 %vm318_vm1, %v1275_v7 }
0x1be5   :  { %2337 = vmatpush3.bf16.msra.mxu0 %v2942_v22  ;;  %2340 = vmatprep.mubr.msk.bf16.mxu0 %vm2632_vm0, %v2631_v0 }
0x1be6   :  { %2338 = vmatprep.subr.bf16.mxu0 %v2631_v0 }
0x1be9   :  { %2339 = vmatpush3.bf16.msra.mxu0 %v2951_v23 }
0x1bea   :  { %2352 = vmatprep.subr.bf16.mxu0 %v2631_v0 }
0x1cb7   :  { %v1314_v15 = vpop.f32.mrb[36].mxu0 }
0x1cb8   :  { %v1315_v16 = vadd.f32 %v1314_v15, %v250_v13  ;;  %v2326_v17 = vpop.f32.mrb[37].mxu0 }
0x1cb9   :  { %v1317_v18 = vpop.f32.mrb[38].mxu0 }
0x1cba   :  { %2489 = vtanh.f32 %v1315_v16  ;;  %v2327_v19 = vpop.f32.mrb[39].mxu0  ;;  %v2114_v21 = vmul.f32 -1.442695, %v1315_v16 }
0x1cbc   :  { %2491 = vpow2.f32 %v2114_v21 }
0x1cc4   :  { %v2490_v20 = vpop.eup %2489 }
0x1cc5   :  { %1333 = vrot.lane.b32.xlu0 %v2490_v20, %s2633_s12 }
0x1cc6   :  { %v2492_v24 = vpop.eup %2491 }
0x1cc7   :  { %v1323_v25 = vadd.f32 1.0, %v2492_v24 }
0x1cc9   :  { %2493 = vrcp.f32 %v1323_v25 }
0x1cd3   :  { %v2494_v26 = vpop.eup %2493 }
0x1cd4   :  { %v1331_v30 = vmul.f32 %v2494_v26, %v1329_v29 }
0x1d37   :  { %v1334_v27 = vpop.permute.xlu0 %1333 }
0x1d38   :  { %v1336_v28 = vmul.f32 %v2494_v26, %v1334_v27 }
0x1d3a   :  { %1338 = vrot.lane.b32.xlu0 %v1336_v28, %s2633_s12 }
0x1d3e   :  { %1351 = vrot.lane.b32.xlu0 %v1264_v5, %s2634_s17 }
0x1dac   :  { %v1339_v31 = vpop.permute.xlu0 %1338 }
0x1dad   :  { %v1341_v32 = vadd.f32 %v1339_v31, %v1331_v30 }
0x1daf   :  { %2495 = vtanh.f32 %v1341_v32  ;;  %v1361_v33 = vsub.f32 %v1341_v32, %v1329_v29 }
0x1db0   :  { %v1352_v35 = vpop.permute.xlu0 %1351 }
0x1db1   :  { %1363 = vrot.lane.b32.xlu0 %v1361_v33, %s2635_s3 }
0x1db9   :  { %v2496_v34 = vpop.eup %2495 }
0x1dba   :  { %1344 = vrot.lane.b32.xlu1 %v2496_v34, %s2633_s12 }
0x1e23   :  { %v1364_v14 = vpop.permute.xlu0 %1363 }
0x1e24   :  { %v1366_v37 = vmul.f32 %v1364_v14, %v1349_v36 }
0x1e26   :  { %v1367_v38 = vadd.f32 %v1366_v37, %v2987_v50 }
0x1e28   :  { %1424 = vrot.lane.b32.xlu0 %v1367_v38, %s2633_s12 }
0x1e2c   :  { %v1345_v39 = vpop.permute.xlu1 %1344 }
0x1e2d   :  { %v1347_v40 = vmul.f32 %v2494_v26, %v1345_v39  ;;  %v258_v26 = vadd.f32 %v3018_v12, %v2994_v57 }
0x1e2f   :  { %v1354_v41 = vsub.f32 %v1347_v40, %v1352_v35 }
0x1e31   :  { %1356 = vrot.lane.b32.xlu1 %v1354_v41, %s2634_s17 }
0x1e9a   :  { %v1425_v56 = vpop.permute.xlu0 %1424 }
0x1ea3   :  { %v1357_v42 = vpop.permute.xlu1 %1356 }
0x1ea4   :  { %v1359_v43 = vmul.f32 %v1357_v42, %v1349_v36 }
0x1ea6   :  { %v1360_v44 = vadd.f32 %v1359_v43, %v1264_v5 }
0x1ea8   :  { %v1368_v45 = vmul.f32 %v1360_v44, %v1349_v36  ;;  %v1371_v46 = vpack.c.bf16 %v1360_v44, %v1360_v44 }
0x1eaa   :  { %1370 = vst.msk [vmem:[#allocation6 + $0x50] sm:$0xff] %vm318_vm1, %v1368_v45  ;;  %2333 = vmatmul.mubr.msk.bf16.vlgmr.msra.gmra.mrb[40].mxu1 %vm318_vm1, %v1371_v46 }
0x1eab   :  { %2345 = vmatpush3.bf16.msra.mxu1 %v2942_v22  ;;  %2348 = vmatprep.mubr.msk.bf16.mxu1 %vm2632_vm0, %v2631_v0 }
0x1eac   :  { %2346 = vmatprep.subr.bf16.mxu1 %v2631_v0 }
0x1eaf   :  { %2347 = vmatpush3.bf16.msra.mxu1 %v2951_v23 }
0x1eb0   :  { %2360 = vmatprep.subr.bf16.mxu1 %v2631_v0 }
0x1f7d   :  { %v1410_v48 = vpop.f32.mrb[40].mxu1 }
0x1f7e   :  { %v1411_v49 = vadd.f32 %v1410_v48, %v253_v47  ;;  %v2334_v50 = vpop.f32.mrb[41].mxu1 }
0x1f7f   :  { %v1413_v51 = vpop.f32.mrb[42].mxu1 }
0x1f80   :  { %2497 = vtanh.f32 %v1411_v49  ;;  %v2335_v52 = vpop.f32.mrb[43].mxu1  ;;  %v2116_v54 = vmul.f32 -1.442695, %v1411_v49 }
0x1f82   :  { %2499 = vpow2.f32 %v2116_v54 }
0x1f8a   :  { %v2498_v53 = vpop.eup %2497 }
0x1f8b   :  { %1429 = vrot.lane.b32.xlu1 %v2498_v53, %s2633_s12 }
0x1f8c   :  { %v2500_v55 = vpop.eup %2499 }
0x1f8d   :  { %v1419_v3 = vadd.f32 1.0, %v2500_v55 }
0x1f8f   :  { %2501 = vrcp.f32 %v1419_v3  ;;  %v261_v3 = vadd.f32 %v3018_v12, %v2996_v4 }
0x1f99   :  { %v2502_v58 = vpop.eup %2501 }
0x1f9a   :  { %v1427_v63 = vmul.f32 %v2502_v58, %v1425_v56 }
0x1ffd   :  { %v1430_v59 = vpop.permute.xlu1 %1429 }
0x1ffe   :  { %v1432_v61 = vmul.f32 %v2502_v58, %v1430_v59 }
0x2000   :  { %1434 = vrot.lane.b32.xlu1 %v1432_v61, %s2633_s12 }
0x2004   :  { %1447 = vrot.lane.b32.xlu1 %v1360_v44, %s2634_s17 }
0x2072   :  { %v1435_v1 = vpop.permute.xlu1 %1434 }
0x2073   :  { %v1437_v2 = vadd.f32 %v1435_v1, %v1427_v63 }
0x2075   :  { %2503 = vtanh.f32 %v1437_v2  ;;  %v1457_v5 = vsub.f32 %v1437_v2, %v1425_v56 }
0x2076   :  { %v1448_v7 = vpop.permute.xlu1 %1447 }
0x2077   :  { %1459 = vrot.lane.b32.xlu1 %v1457_v5, %s2635_s3 }
0x207f   :  { %v2504_v6 = vpop.eup %2503 }
0x2080   :  { %1440 = vrot.lane.b32.xlu0 %v2504_v6, %s2633_s12 }
0x20e9   :  { %v1460_v11 = vpop.permute.xlu1 %1459 }
0x20ea   :  { %v1462_v13 = vmul.f32 %v1460_v11, %v1445_v9 }
0x20ec   :  { %v1463_v15 = vadd.f32 %v1462_v13, %v1367_v38 }
0x20ee   :  { %1520 = vrot.lane.b32.xlu1 %v1463_v15, %s2633_s12 }
0x20f2   :  { %v1441_v16 = vpop.permute.xlu0 %1440 }
0x20f3   :  { %v1443_v17 = vmul.f32 %v2502_v58, %v1441_v16 }
0x20f5   :  { %v1450_v18 = vsub.f32 %v1443_v17, %v1448_v7 }
0x20f7   :  { %1452 = vrot.lane.b32.xlu0 %v1450_v18, %s2634_s17 }
0x2160   :  { %v1521_v57 = vpop.permute.xlu1 %1520 }
0x2169   :  { %v1453_v19 = vpop.permute.xlu0 %1452 }
0x216a   :  { %v1455_v20 = vmul.f32 %v1453_v19, %v1445_v9 }
0x216c   :  { %v1456_v21 = vadd.f32 %v1455_v20, %v1360_v44  ;;  %v1541_v44 = vld [vmem:[#allocation3 + $0x60] sm:$0xff]  ;;  %v1637_v20 = vld [vmem:[#allocation3 + $0x68] sm:$0xff] }
0x216e   :  { %v1464_v24 = vmul.f32 %v1456_v21, %v1445_v9  ;;  %v1467_v25 = vpack.c.bf16 %v1456_v21, %v1456_v21 }
0x2170   :  { %1466 = vst.msk [vmem:[#allocation6 + $0x58] sm:$0xff] %vm318_vm1, %v1464_v24  ;;  %2341 = vmatmul.mubr.msk.bf16.vlgmr.msra.gmra.mrb[40].mxu0 %vm318_vm1, %v1467_v25 }
0x2171   :  { %2353 = vmatpush3.bf16.msra.mxu0 %v2942_v22  ;;  %2356 = vmatprep.mubr.msk.bf16.mxu0 %vm2632_vm0, %v2631_v0 }
0x2172   :  { %2354 = vmatprep.subr.bf16.mxu0 %v2631_v0 }
0x2175   :  { %2355 = vmatpush3.bf16.msra.mxu0 %v2951_v23 }
0x2176   :  { %2368 = vmatprep.subr.bf16.mxu0 %v2631_v0 }
0x2243   :  { %v1506_v27 = vpop.f32.mrb[40].mxu0 }
0x2244   :  { %v1507_v28 = vadd.f32 %v1506_v27, %v258_v26  ;;  %v2342_v29 = vpop.f32.mrb[41].mxu0 }
0x2245   :  { %v1509_v30 = vpop.f32.mrb[42].mxu0 }
0x2246   :  { %2505 = vtanh.f32 %v1507_v28  ;;  %v2343_v31 = vpop.f32.mrb[43].mxu0  ;;  %v2118_v33 = vmul.f32 -1.442695, %v1507_v28 }
0x2248   :  { %2507 = vpow2.f32 %v2118_v33 }
0x2250   :  { %v2506_v32 = vpop.eup %2505 }
0x2251   :  { %1525 = vrot.lane.b32.xlu0 %v2506_v32, %s2633_s12 }
0x2252   :  { %v2508_v34 = vpop.eup %2507 }
0x2253   :  { %v1515_v35 = vadd.f32 1.0, %v2508_v34  ;;  %v266_v34 = vadd.f32 %v3018_v12, %v2998_v60 }
0x2255   :  { %2509 = vrcp.f32 %v1515_v35 }
0x225f   :  { %v2510_v36 = vpop.eup %2509 }
0x2260   :  { %v1523_v38 = vmul.f32 %v2510_v36, %v1521_v57 }
0x22c3   :  { %v1526_v14 = vpop.permute.xlu0 %1525 }
0x22c4   :  { %v1528_v37 = vmul.f32 %v2510_v36, %v1526_v14 }
0x22c6   :  { %1530 = vrot.lane.b32.xlu0 %v1528_v37, %s2633_s12 }
0x22ca   :  { %1543 = vrot.lane.b32.xlu0 %v1456_v21, %s2634_s17 }
0x2338   :  { %v1531_v39 = vpop.permute.xlu0 %1530 }
0x2339   :  { %v1533_v40 = vadd.f32 %v1531_v39, %v1523_v38 }
0x233b   :  { %2511 = vtanh.f32 %v1533_v40  ;;  %v1553_v41 = vsub.f32 %v1533_v40, %v1521_v57 }
0x233c   :  { %v1544_v43 = vpop.permute.xlu0 %1543 }
0x233d   :  { %1555 = vrot.lane.b32.xlu0 %v1553_v41, %s2635_s3 }
0x2345   :  { %v2512_v42 = vpop.eup %2511 }
0x2346   :  { %1536 = vrot.lane.b32.xlu1 %v2512_v42, %s2633_s12 }
0x23af   :  { %v1556_v45 = vpop.permute.xlu0 %1555 }
0x23b0   :  { %v1558_v46 = vmul.f32 %v1556_v45, %v1541_v44 }
0x23b2   :  { %v1559_v47 = vadd.f32 %v1558_v46, %v1463_v15 }
0x23b4   :  { %1616 = vrot.lane.b32.xlu0 %v1559_v47, %s2633_s12 }
0x23b8   :  { %v1537_v48 = vpop.permute.xlu1 %1536 }
0x23b9   :  { %v1539_v49 = vmul.f32 %v2510_v36, %v1537_v48 }
0x23bb   :  { %v1546_v50 = vsub.f32 %v1539_v49, %v1544_v43 }
0x23bd   :  { %1548 = vrot.lane.b32.xlu1 %v1546_v50, %s2634_s17 }
0x2426   :  { %v1617_v4 = vpop.permute.xlu0 %1616 }
0x242f   :  { %v1549_v51 = vpop.permute.xlu1 %1548 }
0x2430   :  { %v1551_v52 = vmul.f32 %v1549_v51, %v1541_v44  ;;  %v1733_v51 = vld [vmem:[#allocation3 + $0x70] sm:$0xff] }
0x2432   :  { %v1552_v53 = vadd.f32 %v1551_v52, %v1456_v21 }
0x2434   :  { %v1560_v54 = vmul.f32 %v1552_v53, %v1541_v44  ;;  %v1563_v55 = vpack.c.bf16 %v1552_v53, %v1552_v53 }
0x2436   :  { %1562 = vst.msk [vmem:[#allocation6 + $0x60] sm:$0xff] %vm318_vm1, %v1560_v54  ;;  %2349 = vmatmul.mubr.msk.bf16.vlgmr.msra.gmra.mrb[44].mxu1 %vm318_vm1, %v1563_v55 }
0x2437   :  { %2361 = vmatpush3.bf16.msra.mxu1 %v2942_v22  ;;  %2364 = vmatprep.mubr.msk.bf16.mxu1 %vm2632_vm0, %v2631_v0 }
0x2438   :  { %2362 = vmatprep.subr.bf16.mxu1 %v2631_v0 }
0x243b   :  { %2363 = vmatpush3.bf16.msra.mxu1 %v2951_v23 }
0x243c   :  { %2376 = vmatprep.subr.bf16.mxu1 %v2631_v0 }
0x2509   :  { %v1602_v58 = vpop.f32.mrb[44].mxu1 }
0x250a   :  { %v1603_v59 = vadd.f32 %v1602_v58, %v261_v3  ;;  %v2350_v61 = vpop.f32.mrb[45].mxu1 }
0x250b   :  { %v1605_v56 = vpop.f32.mrb[46].mxu1 }
0x250c   :  { %2513 = vtanh.f32 %v1603_v59  ;;  %v2351_v63 = vpop.f32.mrb[47].mxu1  ;;  %v2120_v2 = vmul.f32 -1.442695, %v1603_v59 }
0x250e   :  { %2515 = vpow2.f32 %v2120_v2  ;;  %v269_v2 = vadd.f32 %v3018_v12, %v3000_v62 }
0x2516   :  { %v2514_v1 = vpop.eup %2513 }
0x2517   :  { %1621 = vrot.lane.b32.xlu1 %v2514_v1, %s2633_s12 }
0x2518   :  { %v2516_v5 = vpop.eup %2515 }
0x2519   :  { %v1611_v6 = vadd.f32 1.0, %v2516_v5 }
0x251b   :  { %2517 = vrcp.f32 %v1611_v6 }
0x2525   :  { %v2518_v7 = vpop.eup %2517 }
0x2526   :  { %v1619_v13 = vmul.f32 %v2518_v7, %v1617_v4 }
0x2589   :  { %v1622_v9 = vpop.permute.xlu1 %1621 }
0x258a   :  { %v1624_v11 = vmul.f32 %v2518_v7, %v1622_v9 }
0x258c   :  { %1626 = vrot.lane.b32.xlu1 %v1624_v11, %s2633_s12 }
0x2590   :  { %1639 = vrot.lane.b32.xlu1 %v1552_v53, %s2634_s17 }
0x25fe   :  { %v1627_v15 = vpop.permute.xlu1 %1626 }
0x25ff   :  { %v1629_v16 = vadd.f32 %v1627_v15, %v1619_v13 }
0x2601   :  { %2519 = vtanh.f32 %v1629_v16  ;;  %v1649_v17 = vsub.f32 %v1629_v16, %v1617_v4 }
0x2602   :  { %v1640_v19 = vpop.permute.xlu1 %1639 }
0x2603   :  { %1651 = vrot.lane.b32.xlu1 %v1649_v17, %s2635_s3 }
0x260b   :  { %v2520_v18 = vpop.eup %2519 }
0x260c   :  { %1632 = vrot.lane.b32.xlu0 %v2520_v18, %s2633_s12 }
0x2675   :  { %v1652_v21 = vpop.permute.xlu1 %1651 }
0x2676   :  { %v1654_v24 = vmul.f32 %v1652_v21, %v1637_v20 }
0x2678   :  { %v1655_v25 = vadd.f32 %v1654_v24, %v1559_v47 }
0x267a   :  { %1712 = vrot.lane.b32.xlu1 %v1655_v25, %s2633_s12 }
0x267e   :  { %v1633_v26 = vpop.permute.xlu0 %1632 }
0x267f   :  { %v1635_v27 = vmul.f32 %v2518_v7, %v1633_v26 }
0x2681   :  { %v1642_v28 = vsub.f32 %v1635_v27, %v1640_v19 }
0x2683   :  { %1644 = vrot.lane.b32.xlu0 %v1642_v28, %s2634_s17 }
0x26ec   :  { %v1713_v60 = vpop.permute.xlu1 %1712 }
0x26f5   :  { %v1645_v29 = vpop.permute.xlu0 %1644 }
0x26f6   :  { %v1647_v30 = vmul.f32 %v1645_v29, %v1637_v20 }
0x26f8   :  { %v1648_v31 = vadd.f32 %v1647_v30, %v1552_v53 }
0x26fa   :  { %v1656_v32 = vmul.f32 %v1648_v31, %v1637_v20  ;;  %v1659_v33 = vpack.c.bf16 %v1648_v31, %v1648_v31 }
0x26fc   :  { %1658 = vst.msk [vmem:[#allocation6 + $0x68] sm:$0xff] %vm318_vm1, %v1656_v32  ;;  %2357 = vmatmul.mubr.msk.bf16.vlgmr.msra.gmra.mrb[44].mxu0 %vm318_vm1, %v1659_v33 }
0x26fd   :  { %2369 = vmatpush3.bf16.msra.mxu0 %v2942_v22  ;;  %2372 = vmatprep.mubr.msk.bf16.mxu0 %vm2632_vm0, %v2631_v0 }
0x26fe   :  { %2370 = vmatprep.subr.bf16.mxu0 %v2631_v0 }
0x2701   :  { %2371 = vmatpush3.bf16.msra.mxu0 %v2951_v23 }
0x27cf   :  { %v1698_v35 = vpop.f32.mrb[44].mxu0 }
0x27d0   :  { %v1699_v36 = vadd.f32 %v1698_v35, %v266_v34  ;;  %v2358_v14 = vpop.f32.mrb[45].mxu0 }
0x27d1   :  { %v1701_v37 = vpop.f32.mrb[46].mxu0  ;;  %v274_v14 = vadd.f32 %v3018_v12, %v3011_v8 }
0x27d2   :  { %2521 = vtanh.f32 %v1699_v36  ;;  %v2359_v57 = vpop.f32.mrb[47].mxu0  ;;  %v2122_v39 = vmul.f32 -1.442695, %v1699_v36 }
0x27d4   :  { %2523 = vpow2.f32 %v2122_v39 }
0x27dc   :  { %v2522_v38 = vpop.eup %2521 }
0x27dd   :  { %1717 = vrot.lane.b32.xlu0 %v2522_v38, %s2633_s12 }
0x27de   :  { %v2524_v40 = vpop.eup %2523 }
0x27df   :  { %v1707_v41 = vadd.f32 1.0, %v2524_v40 }
0x27e1   :  { %2525 = vrcp.f32 %v1707_v41 }
0x27eb   :  { %v2526_v42 = vpop.eup %2525 }
0x27ec   :  { %v1715_v45 = vmul.f32 %v2526_v42, %v1713_v60 }
0x284f   :  { %v1718_v43 = vpop.permute.xlu0 %1717 }
0x2850   :  { %v1720_v44 = vmul.f32 %v2526_v42, %v1718_v43 }
0x2852   :  { %1722 = vrot.lane.b32.xlu0 %v1720_v44, %s2633_s12 }
0x2856   :  { %1735 = vrot.lane.b32.xlu0 %v1648_v31, %s2634_s17 }
0x28c4   :  { %v1723_v46 = vpop.permute.xlu0 %1722 }
0x28c5   :  { %v1725_v47 = vadd.f32 %v1723_v46, %v1715_v45 }
0x28c7   :  { %2527 = vtanh.f32 %v1725_v47  ;;  %v1745_v48 = vsub.f32 %v1725_v47, %v1713_v60 }
0x28c8   :  { %v1736_v50 = vpop.permute.xlu0 %1735 }
0x28c9   :  { %1747 = vrot.lane.b32.xlu0 %v1745_v48, %s2635_s3 }
0x28d1   :  { %v2528_v49 = vpop.eup %2527 }
0x28d2   :  { %1728 = vrot.lane.b32.xlu1 %v2528_v49, %s2633_s12 }
0x293b   :  { %v1748_v52 = vpop.permute.xlu0 %1747 }
0x293c   :  { %v1750_v53 = vmul.f32 %v1748_v52, %v1733_v51 }
0x293e   :  { %v1751_v54 = vadd.f32 %v1750_v53, %v1655_v25  ;;  %v1829_v25 = vld [vmem:[#allocation3 + $0x78] sm:$0xff]  ;;  %v1925_v53 = vld [vmem:[#allocation3 + $0x80] sm:$0xff] }
0x2940   :  { %1808 = vrot.lane.b32.xlu0 %v1751_v54, %s2633_s12 }
0x2944   :  { %v1729_v55 = vpop.permute.xlu1 %1728 }
0x2945   :  { %v1731_v3 = vmul.f32 %v2526_v42, %v1729_v55 }
0x2947   :  { %v1738_v58 = vsub.f32 %v1731_v3, %v1736_v50 }
0x2949   :  { %1740 = vrot.lane.b32.xlu1 %v1738_v58, %s2634_s17 }
0x29b2   :  { %v1809_v62 = vpop.permute.xlu0 %1808 }
0x29bb   :  { %v1741_v59 = vpop.permute.xlu1 %1740 }
0x29bc   :  { %v1743_v61 = vmul.f32 %v1741_v59, %v1733_v51 }
0x29be   :  { %v1744_v56 = vadd.f32 %v1743_v61, %v1648_v31 }
0x29c0   :  { %v1752_v63 = vmul.f32 %v1744_v56, %v1733_v51  ;;  %v1755_v1 = vpack.c.bf16 %v1744_v56, %v1744_v56 }
0x29c2   :  { %1754 = vst.msk [vmem:[#allocation6 + $0x70] sm:$0xff] %vm318_vm1, %v1752_v63  ;;  %2365 = vmatmul.mubr.msk.bf16.vlgmr.msra.gmra.mrb[48].mxu1 %vm318_vm1, %v1755_v1 }
0x29c3   :  { %2377 = vmatpush3.bf16.msra.mxu1 %v2942_v22  ;;  %2380 = vmatprep.mubr.msk.bf16.mxu1 %vm2632_vm0, %v2631_v0 }
0x29c4   :  { %2378 = vmatprep.subr.bf16.mxu1 %v2631_v0 }
0x29c7   :  { %2379 = vmatpush3.bf16.msra.mxu1 %v2951_v23 }
0x2a95   :  { %v1794_v5 = vpop.f32.mrb[48].mxu1 }
0x2a96   :  { %v1795_v6 = vadd.f32 %v1794_v5, %v269_v2  ;;  %v2366_v7 = vpop.f32.mrb[49].mxu1 }
0x2a97   :  { %v1797_v9 = vpop.f32.mrb[50].mxu1 }
0x2a98   :  { %2529 = vtanh.f32 %v1795_v6  ;;  %v2367_v11 = vpop.f32.mrb[51].mxu1  ;;  %v2124_v22 = vmul.f32 -1.442695, %v1795_v6  ;;  %v277_v6 = vadd.f32 %v3018_v12, %v3013_v10 }
0x2a9a   :  { %2531 = vpow2.f32 %v2124_v22 }
0x2aa2   :  { %v2530_v4 = vpop.eup %2529 }
0x2aa3   :  { %1813 = vrot.lane.b32.xlu1 %v2530_v4, %s2633_s12 }
0x2aa4   :  { %v2532_v13 = vpop.eup %2531 }
0x2aa5   :  { %v1803_v15 = vadd.f32 1.0, %v2532_v13 }
0x2aa7   :  { %2533 = vrcp.f32 %v1803_v15 }
0x2ab1   :  { %v2534_v0 = vpop.eup %2533 }
0x2ab2   :  { %v1811_v17 = vmul.f32 %v2534_v0, %v1809_v62 }
0x2b15   :  { %v1814_v16 = vpop.permute.xlu1 %1813 }
0x2b16   :  { %v1816_v23 = vmul.f32 %v2534_v0, %v1814_v16 }
0x2b18   :  { %1818 = vrot.lane.b32.xlu1 %v1816_v23, %s2633_s12 }
0x2b1c   :  { %1831 = vrot.lane.b32.xlu1 %v1744_v56, %s2634_s17 }
0x2b8a   :  { %v1819_v18 = vpop.permute.xlu1 %1818 }
0x2b8b   :  { %v1821_v19 = vadd.f32 %v1819_v18, %v1811_v17 }
0x2b8d   :  { %2535 = vtanh.f32 %v1821_v19  ;;  %v1841_v20 = vsub.f32 %v1821_v19, %v1809_v62 }
0x2b8e   :  { %v1832_v24 = vpop.permute.xlu1 %1831 }
0x2b8f   :  { %1843 = vrot.lane.b32.xlu1 %v1841_v20, %s2635_s3 }
0x2b97   :  { %v2536_v21 = vpop.eup %2535 }
0x2b98   :  { %1824 = vrot.lane.b32.xlu0 %v2536_v21, %s2633_s12 }
0x2c01   :  { %v1844_v26 = vpop.permute.xlu1 %1843 }
0x2c02   :  { %v1846_v27 = vmul.f32 %v1844_v26, %v1829_v25 }
0x2c04   :  { %v1847_v28 = vadd.f32 %v1846_v27, %v1751_v54  ;;  %v2021_v27 = vld [vmem:[#allocation3 + $0x88] sm:$0xff] }
0x2c06   :  { %1904 = vrot.lane.b32.xlu1 %v1847_v28, %s2633_s12 }
0x2c0a   :  { %v1825_v29 = vpop.permute.xlu0 %1824 }
0x2c0b   :  { %v1827_v30 = vmul.f32 %v2534_v0, %v1825_v29 }
0x2c0d   :  { %v1834_v31 = vsub.f32 %v1827_v30, %v1832_v24 }
0x2c0f   :  { %1836 = vrot.lane.b32.xlu0 %v1834_v31, %s2634_s17 }
0x2c78   :  { %v1905_v8 = vpop.permute.xlu1 %1904 }
0x2c81   :  { %v1837_v32 = vpop.permute.xlu0 %1836 }
0x2c82   :  { %v1839_v33 = vmul.f32 %v1837_v32, %v1829_v25 }
0x2c84   :  { %v1840_v34 = vadd.f32 %v1839_v33, %v1744_v56 }
0x2c86   :  { %v1848_v35 = vmul.f32 %v1840_v34, %v1829_v25  ;;  %v1851_v36 = vpack.c.bf16 %v1840_v34, %v1840_v34 }
0x2c88   :  { %1850 = vst.msk [vmem:[#allocation6 + $0x78] sm:$0xff] %vm318_vm1, %v1848_v35  ;;  %2373 = vmatmul.mubr.msk.bf16.vlgmr.msra.gmra.mrb[48].mxu0 %vm318_vm1, %v1851_v36 }
0x2d5b   :  { %v1890_v37 = vpop.f32.mrb[48].mxu0 }
0x2d5c   :  { %v1891_v57 = vadd.f32 %v1890_v37, %v274_v14  ;;  %v2374_v38 = vpop.f32.mrb[49].mxu0 }
0x2d5d   :  { %v1893_v39 = vpop.f32.mrb[50].mxu0 }
0x2d5e   :  { %2537 = vtanh.f32 %v1891_v57  ;;  %v2375_v40 = vpop.f32.mrb[51].mxu0  ;;  %v2126_v42 = vmul.f32 -1.442695, %v1891_v57 }
0x2d60   :  { %2539 = vpow2.f32 %v2126_v42 }
0x2d68   :  { %v2538_v41 = vpop.eup %2537 }
0x2d69   :  { %1909 = vrot.lane.b32.xlu0 %v2538_v41, %s2633_s12 }
0x2d6a   :  { %v2540_v43 = vpop.eup %2539 }
0x2d6b   :  { %v1899_v44 = vadd.f32 1.0, %v2540_v43 }
0x2d6d   :  { %2541 = vrcp.f32 %v1899_v44 }
0x2d77   :  { %v2542_v60 = vpop.eup %2541 }
0x2d78   :  { %v1907_v47 = vmul.f32 %v2542_v60, %v1905_v8 }
0x2ddb   :  { %v1910_v45 = vpop.permute.xlu0 %1909 }
0x2ddc   :  { %v1912_v46 = vmul.f32 %v2542_v60, %v1910_v45 }
0x2dde   :  { %1914 = vrot.lane.b32.xlu0 %v1912_v46, %s2633_s12 }
0x2de2   :  { %1927 = vrot.lane.b32.xlu0 %v1840_v34, %s2634_s17 }
0x2e50   :  { %v1915_v48 = vpop.permute.xlu0 %1914 }
0x2e51   :  { %v1917_v49 = vadd.f32 %v1915_v48, %v1907_v47 }
0x2e53   :  { %2543 = vtanh.f32 %v1917_v49  ;;  %v1937_v50 = vsub.f32 %v1917_v49, %v1905_v8 }
0x2e54   :  { %v1928_v52 = vpop.permute.xlu0 %1927 }
0x2e55   :  { %1939 = vrot.lane.b32.xlu0 %v1937_v50, %s2635_s3  ;;  %s2637_s3 = smov [#allocation6]  }
0x2e56   :  { %s2042_s18 = sshll.u32 %s2637_s3, 4  ;;  %s3133_s18 = int_to_ptr.vmem [resolvable:$true] %s2042_s18 }
0x2e5d   :  { %v2544_v51 = vpop.eup %2543 }
0x2e5e   :  { %1920 = vrot.lane.b32.xlu1 %v2544_v51, %s2633_s12 }
0x2ec7   :  { %v1940_v54 = vpop.permute.xlu0 %1939 }
0x2ec8   :  { %v1942_v55 = vmul.f32 %v1940_v54, %v1925_v53 }
0x2eca   :  { %v1943_v3 = vadd.f32 %v1942_v55, %v1847_v28 }
0x2ecc   :  { %2000 = vrot.lane.b32.xlu0 %v1943_v3, %s2633_s12 }
0x2ed0   :  { %v1921_v58 = vpop.permute.xlu1 %1920 }
0x2ed1   :  { %v1923_v59 = vmul.f32 %v2542_v60, %v1921_v58 }
0x2ed3   :  { %v1930_v61 = vsub.f32 %v1923_v59, %v1928_v52 }
0x2ed5   :  { %1932 = vrot.lane.b32.xlu1 %v1930_v61, %s2634_s17 }
0x2f3e   :  { %v2001_v10 = vpop.permute.xlu0 %2000 }
0x2f47   :  { %v1933_v56 = vpop.permute.xlu1 %1932 }
0x2f48   :  { %v1935_v63 = vmul.f32 %v1933_v56, %v1925_v53 }
0x2f4a   :  { %v1936_v1 = vadd.f32 %v1935_v63, %v1840_v34 }
0x2f4c   :  { %v1944_v2 = vmul.f32 %v1936_v1, %v1925_v53  ;;  %v1947_v5 = vpack.c.bf16 %v1936_v1, %v1936_v1 }
0x2f4e   :  { %1946 = vst.msk [vmem:[#allocation6 + $0x80] sm:$0xff] %vm318_vm1, %v1944_v2  ;;  %2381 = vmatmul.mubr.msk.bf16.vlgmr.msra.gmra.mrb[52].mxu1 %vm318_vm1, %v1947_v5 }
0x3021   :  { %v1986_v7 = vpop.f32.mrb[52].mxu1 }
0x3022   :  { %v1987_v9 = vadd.f32 %v1986_v7, %v277_v6  ;;  %v2382_v11 = vpop.f32.mrb[53].mxu1 }
0x3023   :  { %v1989_v4 = vpop.f32.mrb[54].mxu1 }
0x3024   :  { %2545 = vtanh.f32 %v1987_v9  ;;  %v2383_v22 = vpop.f32.mrb[55].mxu1  ;;  %v2128_v15 = vmul.f32 -1.442695, %v1987_v9 }
0x3026   :  { %2547 = vpow2.f32 %v2128_v15 }
0x302e   :  { %v2546_v13 = vpop.eup %2545 }
0x302f   :  { %2005 = vrot.lane.b32.xlu1 %v2546_v13, %s2633_s12 }
0x3030   :  { %v2548_v0 = vpop.eup %2547 }
0x3031   :  { %v1995_v16 = vadd.f32 1.0, %v2548_v0 }
0x3033   :  { %2549 = vrcp.f32 %v1995_v16 }
0x303d   :  { %v2550_v23 = vpop.eup %2549 }
0x303e   :  { %v2003_v12 = vmul.f32 %v2550_v23, %v2001_v10 }
0x30a1   :  { %v2006_v62 = vpop.permute.xlu1 %2005 }
0x30a2   :  { %v2008_v17 = vmul.f32 %v2550_v23, %v2006_v62 }
0x30a4   :  { %2010 = vrot.lane.b32.xlu1 %v2008_v17, %s2633_s12 }
0x30a8   :  { %2023 = vrot.lane.b32.xlu1 %v1936_v1, %s2634_s17 }
0x3116   :  { %v2011_v18 = vpop.permute.xlu1 %2010 }
0x3117   :  { %v2013_v19 = vadd.f32 %v2011_v18, %v2003_v12 }
0x3119   :  { %2551 = vtanh.f32 %v2013_v19 }
0x311a   :  { %v2024_v25 = vpop.permute.xlu1 %2023 }
0x3123   :  { %v2552_v20 = vpop.eup %2551 }
0x3124   :  { %2016 = vrot.lane.b32.xlu0 %v2552_v20, %s2633_s12  ;;  %s2578_s12 = scalar_lea.vmem %s2056_s14, 128 }
0x3125   :  { %p2579_p8 = scmp.ne.s32.totalorder %s2056_s14, %s2578_s12  ;;  %p2584_p10 = scmp.lt.s32.totalorder %s2578_s12, %s2578_s12 }
0x3127   :  { %p2585_p11 = por %p2584_p10, %p2583_p9 }
0x3129   :  { %p2586_p12 = pnand %p2585_p11, %p2579_p8 }
0x3196   :  { %v2017_v21 = vpop.permute.xlu0 %2016 }
0x3197   :  { %v2019_v24 = vmul.f32 %v2550_v23, %v2017_v21 }
0x3199   :  { %v2026_v26 = vsub.f32 %v2019_v24, %v2024_v25 }
0x319b   :  { %2028 = vrot.lane.b32.xlu0 %v2026_v26, %s2634_s17 }
0x320d   :  { %v2029_v28 = vpop.permute.xlu0 %2028 }
0x320e   :  { %v2031_v29 = vmul.f32 %v2029_v28, %v2021_v27 }
0x3210   :  { %v2032_v30 = vadd.f32 %v2031_v29, %v1936_v1 }
0x3212   :  { %v2033_v31 = vmul.f32 %v2032_v30, %v2021_v27  ;;  %2036 = vst.msk [vmem:[#allocation7] sm:$0xff] %vm318_vm1, %v2032_v30 }
0x3213   :  { %2589 = shalt.err (!%p2586_p12)
}
0x3214   :  { %s2590_s20 = scalar_lea.hbm %s3176_s8, 128 }
0x3215   :  { %p2591_p13 = scmp.ne.s32.totalorder %s3176_s8, %s2590_s20  ;;  %p2594_p0 = scmp.lt.u32.totalorder %s2590_s20, %s3176_s8 }
0x3217   :  { %p2596_p1 = pnand %p2594_p0, %p2591_p13 }
0x3219   :  { %2599 = shalt.err (!%p2596_p1)
}
0x321a   :  { %2058 = dma.vmem_to_hbm [thread:$0]  %s2056_s14, 128, %s3176_s8, [#allocation8]   ;;  %2035 = vst.msk [vmem:[#allocation6 + $0x88] sm:$0xff] %vm318_vm1, %v2033_v31 }
0x321b   :  { %s2600_s26 = scalar_lea.vmem %s3133_s18, 2304  ;;  %p2605_p3 = scmp.lt.s32.totalorder %s3133_s18, %s3133_s18 }
0x321c   :  { %p2601_p2 = scmp.ne.s32.totalorder %s3133_s18, %s2600_s26  ;;  %p2606_p4 = scmp.lt.s32.totalorder %s2600_s26, %s2600_s26 }
0x321e   :  { %p2607_p5 = por %p2606_p4, %p2605_p3 }
0x3220   :  { %p2608_p6 = pnand %p2607_p5, %p2601_p2 }
0x3222   :  { %2611 = shalt.err (!%p2608_p6)
}
0x3223   :  { %s2612_s6 = scalar_lea.hbm %s3175_s7, 2304 }
0x3224   :  { %p2613_p7 = scmp.ne.s32.totalorder %s3175_s7, %s2612_s6  ;;  %p2616_p8 = scmp.lt.u32.totalorder %s2612_s6, %s3175_s7 }
0x3226   :  { %p2618_p9 = pnand %p2616_p8, %p2613_p7 }
0x3228   :  { %2621 = shalt.err (!%p2618_p9)
}
0x3229   :  { %2048 = dma.vmem_to_hbm [thread:$0]  %s3133_s18, 2304, %s3175_s7, [#allocation5], %s2629_s15, %s2629_s15, %s2630_s16  }
0x322a   :  { %2624 = dma.done.wait [#allocation5], 2304  }
0x322b   :  { %2625 = vsyncadd [#allocation5], 4294964992 }
0x322c   :  { %2626 = dma.done.wait [#allocation8], 128  }
0x322d   :  { %2627 = vsyncadd [#allocation8], 4294967168 }
0x322e   :  { %2065 = vsyncpa [#allocation4], 1 }
0x322f   :  { %2066 = vsyncpa [#allocation5], 1 }
0x3230   :  { %2067 = vsyncpa [#allocation8], 1 }

</bundles_post_ra>
